<compile_context>
chip_gen: v7x
topology: tpu7x:2x2x1
jax: 0.10.0
libtpu: 0.0.40
codegen_flags: <defaults>
</compile_context>

<pallas_src>
import functools

import jax
import jax.numpy as jnp
from jax.experimental import pallas as pl
from jax.experimental.pallas import tpu as pltpu

GEO_THRES = 0.3       # geodesic exclusion radius (contact-module proxy)
CONTACT_THRES = 0.02  # "vertex in contact" euclidean threshold (proxy)
_BIG = 1e30           # finite sentinel (must stay < inf so bit packing is NaN-free)


def _round_up(x, m):
    return ((x + m - 1) // m) * m


def _pick_frame_block(num_frames, q_tiles):
    """Largest frame block (mask-DMA reuse factor) that divides F while keeping
    at least two parallel grid units (v7x has two TensorCores)."""
    for tf in (4, 2):
        if num_frames % tf == 0 and (num_frames // tf) * q_tiles >= 2:
            return tf
    return 1


# --------------------------------------------------------------------------
# Pallas kernel: frame-batched, tiled, geodesic-filtered min distance
# --------------------------------------------------------------------------
def _make_min_dist_kernel(nv_valid, tnv, idx_bits, with_argmin):
    """d2 on the MXU via an augmented K=8 matmul per frame:
         A = [vx, vy, vz, |v|^2, 1, 0, 0, 0]          (TNV, 8)
         B = [-2qx; -2qy; -2qz; 1; |q|^2; 0; 0; 0]    (8, TQ)
       d2 = A @ B, fp32 contract precision (default bf16 passes would put
       ~1e-4 absolute error on d2, comparable to CONTACT_THRES^2).
       min+argmin are fused into a single reduce on a packed key (low
       idx_bits mantissa bits of d2 replaced by the local row index)."""
    lo_mask = (1 << idx_bits) - 1
    hi_mask = ~lo_mask

    def kernel(a_ref, b_ref, m_ref, dmin_ref, *opt_idx):
        idx_ref = opt_idx[0] if with_argmin else None
        k = pl.program_id(2)
        nk = pl.num_programs(2)

        @pl.when(k == 0)
        def _init():
            dmin_ref[...] = jnp.full(dmin_ref.shape, _BIG, jnp.float32)
            if with_argmin:
                idx_ref[...] = jnp.zeros(idx_ref.shape, jnp.int32)

        excl = m_ref[...] != 0                                   # (TNV, TQ)
        if with_argmin:
            row_iota = jax.lax.broadcasted_iota(jnp.int32, excl.shape, 0)

        tf = a_ref.shape[0]
        for t in range(tf):                                      # frame block
            d2 = jnp.dot(a_ref[t], b_ref[t],
                         preferred_element_type=jnp.float32,
                         precision=jax.lax.Precision.HIGHEST)    # (TNV, TQ)
            d2 = jnp.maximum(d2, 0.0)                            # cancellation
            d2 = jnp.where(excl, jnp.float32(_BIG), d2)          # geodesic excl
            if with_argmin:
                # Packed (value | local index) key; one float min over the
                # sublane axis yields both min and argmin.
                key = (pltpu.bitcast(d2, jnp.int32) & hi_mask) | row_iota
                kmin = jnp.min(pltpu.bitcast(key, jnp.float32),
                               axis=0, keepdims=True)            # (1, TQ)
                kbits = pltpu.bitcast(kmin, jnp.int32)
                tile_val = pltpu.bitcast(kbits & hi_mask, jnp.float32)
                tile_idx = (kbits & lo_mask) + k * tnv
                cur = dmin_ref[t]
                better = tile_val < cur
                dmin_ref[t] = jnp.where(better, tile_val, cur)
                idx_ref[t] = jnp.where(better, tile_idx, idx_ref[t])
            else:
                dmin_ref[t] = jnp.minimum(
                    jnp.min(d2, axis=0, keepdims=True), dmin_ref[t])

        @pl.when(k == nk - 1)
        def _finalize():
            # Rows with no valid candidate still carry the sentinel; clamp so
            # the sqrt stays finite, and keep argmin always in range.
            dmin_ref[...] = jnp.sqrt(jnp.minimum(dmin_ref[...],
                                                 jnp.float32(1e12)))
            if with_argmin:
                idx_ref[...] = jnp.clip(idx_ref[...], 0, nv_valid - 1)

    return kernel


def pallas_min_dist_batched(queries, verts, excl_mask_T, *, with_argmin=True):
    """Per-query min euclidean distance to verts (geodesically-close excluded).

    queries     : (F, Q, 3)  float32 query points per frame
    verts       : (F, NV, 3) float32 candidate vertices per frame
    excl_mask_T : (NV, Q)    int8, 1 where candidate j is excluded for query i
    returns dmin (F, Q) f32 [, idx (F, Q) i32 when with_argmin]
    """
    F, Q, _ = queries.shape
    NV = verts.shape[1]

    TQ = 512 if Q >= 512 else (256 if Q >= 256 else 128)
    TNV = 1024 if NV >= 1024 else _round_up(max(NV, 32), 32)
    Qp = _round_up(Q, TQ)
    NVp = _round_up(NV, TNV)
    q_tiles, nv_tiles = Qp // TQ, NVp // TNV
    TF = _pick_frame_block(F, q_tiles)

    qf = jnp.pad(queries.astype(jnp.float32), ((0, 0), (0, Qp - Q), (0, 0)))
    vf = jnp.pad(verts.astype(jnp.float32), ((0, 0), (0, NVp - NV), (0, 0)))
    vv = jnp.sum(vf * vf, axis=-1, keepdims=True)
    a_aug = jnp.concatenate([vf, vv, jnp.ones_like(vv), jnp.zeros_like(vf)],
                            axis=-1)                              # (F, NVp, 8)
    qq = jnp.sum(qf * qf, axis=-1, keepdims=True)
    b_aug = jnp.concatenate([-2.0 * qf, jnp.ones_like(qq), qq,
                             jnp.zeros_like(qf)], axis=-1)        # (F, Qp, 8)
    b_aug = jnp.transpose(b_aug, (0, 2, 1))                       # (F, 8, Qp)
    mp = jnp.pad(excl_mask_T.astype(jnp.int8),
                 ((0, NVp - NV), (0, Qp - Q)), constant_values=1)

    idx_bits = int(TNV - 1).bit_length()
    kernel = _make_min_dist_kernel(NV, TNV, idx_bits, with_argmin)

    out_shape = [jax.ShapeDtypeStruct((F, 1, Qp), jnp.float32)]
    out_specs = [pl.BlockSpec((TF, 1, TQ), lambda f, i, k: (f, 0, i))]
    if with_argmin:
        out_shape.append(jax.ShapeDtypeStruct((F, 1, Qp), jnp.int32))
        out_specs.append(pl.BlockSpec((TF, 1, TQ), lambda f, i, k: (f, 0, i)))

    cost = pl.CostEstimate(
        flops=2 * F * NVp * Qp * 8,
        transcendentals=0,
        bytes_accessed=int(F * q_tiles * NVp * 32 + F * nv_tiles * Qp * 32 +
                           (F // TF) * NVp * Qp + 2 * F * Qp * 4))

    outs = pl.pallas_call(
        kernel,
        out_shape=tuple(out_shape) if with_argmin else out_shape[0],
        grid=(F // TF, q_tiles, nv_tiles),
        in_specs=[pl.BlockSpec((TF, TNV, 8), lambda f, i, k: (f, k, 0)),
                  pl.BlockSpec((TF, 8, TQ), lambda f, i, k: (f, 0, i)),
                  pl.BlockSpec((TNV, TQ), lambda f, i, k: (k, i))],
        out_specs=tuple(out_specs) if with_argmin else out_specs[0],
        compiler_params=pltpu.CompilerParams(
            dimension_semantics=("parallel", "parallel", "arbitrary")),
        cost_estimate=cost,
    )(a_aug, b_aug, mp)

    if with_argmin:
        dmin, idx = outs
        return dmin[:, 0, :Q], idx[:, 0, :Q]
    return outs[:, 0, :Q]


# --------------------------------------------------------------------------
# JAX glue
# --------------------------------------------------------------------------
def _masked_mean(x, mask):
    m = mask.astype(x.dtype)
    cnt = jnp.sum(m)
    return jnp.where(cnt > 0, jnp.sum(x * m) / jnp.maximum(cnt, 1.0), 0.0)


def compute_vertex_normals(vertices, faces):
    """vertices: (1, NV, 3); faces: (NF, 3) int -> (1, NV, 3) unit normals."""
    v = vertices[0]
    v0, v1, v2 = v[faces[:, 0]], v[faces[:, 1]], v[faces[:, 2]]
    fn = jnp.cross(v1 - v0, v2 - v0)
    vn = jnp.zeros_like(v)
    vn = vn.at[faces[:, 0]].add(fn)
    vn = vn.at[faces[:, 1]].add(fn)
    vn = vn.at[faces[:, 2]].add(fn)
    nrm = jnp.sqrt(jnp.sum(vn * vn, axis=1, keepdims=True))
    return (vn / jnp.maximum(nrm, 1e-12))[None]


class SelfContactOptiAnimAssignLossPallas:
    def __init__(self, geodist, faces, ds, hand_contact_prior,
                 hand_contact_prior_weights, inside_loss_weight,
                 outside_loss_weight, contact_loss_weight,
                 hand_contact_prior_weight, pose_prior_weight,
                 hand_pose_prior_weight, angle_weight, smooth_angle_weight,
                 smooth_joints_weight, smooth_verts_weight,
                 alpha1=0.04, alpha2=0.04, beta1=0.07, beta2=0.06,
                 gamma1=0.01, gamma2=0.01, delta1=0.023, delta2=0.02,
                 fps=30, frame_num=10, extremities_index_21=tuple(range(21))):
        self.geodist = geodist.astype(jnp.float32)
        self.faces = faces
        self.ds = ds
        self.hand_contact_prior = hand_contact_prior
        self.hand_contact_prior_weights = hand_contact_prior_weights
        self.inside_w = inside_loss_weight
        self.outside_w = outside_loss_weight
        self.contact_w = contact_loss_weight
        self.hand_contact_prior_weight = hand_contact_prior_weight
        self.pose_prior_weight = pose_prior_weight
        self.hand_pose_prior_weight = hand_pose_prior_weight
        self.angle_weight = angle_weight
        self.smooth_angle_weight = smooth_angle_weight
        self.smooth_joints_weight = smooth_joints_weight
        self.smooth_verts_weight = smooth_verts_weight
        self.a1, self.a2 = alpha1, alpha2
        self.b1, self.b2 = beta1, beta2
        self.c1, self.c2 = gamma1, gamma2
        self.d1, self.d2 = delta1, delta2
        self.fps = fps
        self.frame_num = frame_num
        self.extremities_index_21 = list(extremities_index_21)

        # Geodesic exclusion mask precomputed once as int8 (4x less HBM
        # traffic than streaming f32 geodist rows into the kernel).
        self._geo_excl_mask = (self.geodist < GEO_THRES).astype(jnp.int8)
        # Combined query set used every frame in forward(): hand verts + ds.
        self._fwd_query_ids = jnp.concatenate([self.hand_contact_prior,
                                               self.ds]).astype(jnp.int32)
        self._fwd_mask_T = self._geo_excl_mask[:, self._fwd_query_ids]

    # -------------------- configure --------------------
    def configure(self, init_poses, init_verts):
        if self.contact_w <= 0 and self.outside_w <= 0:
            return
        self.init_poses = init_poses            # (F, 1, 63)
        self.init_verts = init_verts            # (F, 1, NV, 3)
        verts = init_verts[:, 0].astype(jnp.float16).astype(jnp.float32)
        # TODO(synk): cm.segment_vertices contact test approximated by a
        # geodesic-filtered euclidean-distance threshold.
        # argmin disabled for this O(NV^2) pass: only the contact flag matters.
        dmin = pallas_min_dist_batched(verts, verts, self._geo_excl_mask,
                                       with_argmin=False)
        contact = dmin < CONTACT_THRES                       # (F, NV) bool
        self.init_verts_in_contact = contact
        self.has_contact = jnp.any(contact, axis=1)          # (F,)
        # Per-frame geodesic attraction weights hoisted out of forward(): the
        # NVxNV geodist is streamed once per configure, not per frame/forward.
        gdi = []
        for f in range(contact.shape[0]):
            g = jnp.min(jnp.where(contact[f][None, :], self.geodist, _BIG),
                        axis=1)
            gdi.append(jnp.minimum(g, 1e3))
        self.gdi = jnp.stack(gdi)                            # (F, NV)

    # -------------------- per-frame loss --------------------
    def single_forward(self, idx, vertices, v_cast, vn, body_pose,
                       left_hand_pose, right_hand_pose, v2v_hand_min,
                       v2v_ds_min, v2v_ds_min_idx):
        nv = vertices.shape[1]
        ds = self.ds
        hand_ids = self.hand_contact_prior

        # inside/outside segmentation
        # TODO(synk): SelfContact's ray/winding-based segment_points_scopti_ds
        # has no clean Pallas equivalent; replaced by a nearest-vertex-normal
        # sign test on the Pallas arg-min result.
        near = v2v_ds_min_idx                                       # (Nds,)
        exterior = jnp.sum((v_cast[ds] - v_cast[near]) * vn[near],
                           axis=1) >= 0.0
        inside_ds = ~exterior
        inside = jnp.zeros((nv,), dtype=bool).at[ds].set(inside_ds)

        has_contact = self.has_contact[idx]
        gdi = self.gdi[idx]                                         # (NV,)

        contactloss = jnp.float32(0.0)
        if self.contact_w > 0:
            weights_outside = jnp.where(has_contact,
                                        1.0 / (5.0 * gdi + 1.0), 1.0)
            attraction = weights_outside[ds]
            v2voutside = self.a1 * attraction * jnp.tanh(v2v_ds_min / self.a2)
            contactloss = self.contact_w * _masked_mean(v2voutside, ~inside_ds)

        insideloss = jnp.float32(0.0)
        if self.inside_w > 0:
            v2vinside = self.b1 * jnp.tanh(v2v_ds_min / self.b2)
            insideloss = self.inside_w * _masked_mean(v2vinside, inside_ds)

        hand_contact_loss = jnp.float32(0.0)
        if self.hand_contact_prior_weight > 0:
            ha = hand_ids.shape[0] // 2
            hvi = inside[hand_ids]
            lo, ro = v2v_hand_min[:ha], v2v_hand_min[ha:]
            hcw = self.hand_contact_prior_weights
            # outside part
            m_lo, m_ro = ~hvi[:ha], ~hvi[ha:]
            lo_gate = jnp.sum(jnp.where(m_lo, lo, 0.0)) > 0
            ro_gate = jnp.sum(jnp.where(m_ro, ro, 0.0)) > 0
            lo_vals = jnp.where(lo_gate, self.c1 * jnp.tanh(lo / self.c2), 0.0)
            ro_vals = jnp.where(ro_gate, self.c1 * jnp.tanh(ro / self.c2), 0.0)
            lw = -0.1 * hcw[:ha] + 1.0
            rw = -0.1 * hcw[ha:] + 1.0
            hcl_out = (_masked_mean(lw * lo_vals, m_lo) +
                       _masked_mean(rw * ro_vals, m_ro))
            hcl_out = jnp.where(jnp.sum(~hvi) > 0, hcl_out, 0.0)
            # inside part
            m_li, m_ri = hvi[:ha], hvi[ha:]
            li_gate = jnp.sum(jnp.where(m_li, lo, 0.0)) > 0
            ri_gate = jnp.sum(jnp.where(m_ri, ro, 0.0)) > 0
            li_vals = jnp.where(li_gate, self.d1 * jnp.tanh(lo / self.d2), 0.0)
            ri_vals = jnp.where(ri_gate, self.d1 * jnp.tanh(ro / self.d2), 0.0)
            hcl_in = _masked_mean(li_vals, m_li) + _masked_mean(ri_vals, m_ri)
            hcl_in = jnp.where(jnp.sum(hvi) > 0, hcl_in, 0.0)
            hand_contact_loss = self.hand_contact_prior_weight * (hcl_in +
                                                                  hcl_out)

        angle_loss = jnp.float32(0.0)
        if self.angle_weight > 0:
            # mean_j(1 + n_j . n_near) == 1 + mean(n) . n_near : the NVxNV
            # normals Gram matmul of the reference reduces to a (3,) dot.
            mask_close = v2v_ds_min < 0.01
            vn_mean = jnp.mean(vn, axis=0)                          # (3,)
            col_mean = 1.0 + vn[near] @ vn_mean                     # (Nds,)
            angle_loss = self.angle_weight * _masked_mean(col_mean, mask_close)

        pose_prior_loss = jnp.float32(0.0)
        if self.pose_prior_weight > 0:
            pose_prior_loss = self.pose_prior_weight * jnp.sum(
                (body_pose - self.init_poses[idx]) ** 2)

        hand_pose_prior_loss = jnp.float32(0.0)
        if self.hand_pose_prior_weight > 0:  # L2Prior = sum of squares
            hand_pose_prior_loss = self.hand_pose_prior_weight * (
                jnp.sum(left_hand_pose ** 2) + jnp.sum(right_hand_pose ** 2))

        outsideloss = jnp.float32(0.0)
        if self.outside_w > 0:
            d = self.init_verts[idx][0] - vertices[0]               # (NV, 3)
            vnorm = jnp.sqrt(jnp.sum(d * d, axis=1))                # (NV,)
            w2 = jnp.where(has_contact, (2.0 * gdi) ** 2, 1.0)
            outsideloss = self.outside_w * jnp.sum(vnorm * w2)

        loss = (insideloss + contactloss + outsideloss + pose_prior_loss +
                hand_pose_prior_loss + angle_loss + hand_contact_loss)
        loss_dict = {'Total': loss, 'Contact': contactloss,
                     'Inside': insideloss, 'Outside': outsideloss,
                     'Angles': angle_loss, 'HandContact': hand_contact_loss,
                     'HandPosePrior': hand_pose_prior_loss,
                     'BodyPosePrior': pose_prior_loss}
        return loss, loss_dict

    # -------------------- quaternion smoothing (JAX glue) --------------------
    def get_quat_from_rodrigues(self, r):
        angle = jnp.sqrt(jnp.sum(r * r))
        axis = r / jnp.maximum(angle, 1e-12)
        half = angle / 2.0
        quat = jnp.concatenate([jnp.cos(half)[None], jnp.sin(half) * axis])
        return jnp.where(angle == 0, jnp.array([1.0, 0.0, 0.0, 0.0]), quat)

    def quaternion_multiply(self, q1, q0):
        w0, x0, y0, z0 = q0[..., 0], q0[..., 1], q0[..., 2], q0[..., 3]
        w1, x1, y1, z1 = q1[..., 0], q1[..., 1], q1[..., 2], q1[..., 3]
        return jnp.stack([
            -x1 * x0 - y1 * y0 - z1 * z0 + w1 * w0,
            x1 * w0 + y1 * z0 - z1 * y0 + w1 * x0,
            -x1 * z0 + y1 * w0 + z1 * x0 + w1 * y0,
            x1 * y0 - y1 * x0 + z1 * w0 + w1 * z0], axis=-1)

    def quaternion_inverse(self, q):
        conj = q * jnp.array([1.0, -1.0, -1.0, -1.0])
        norm = jnp.sqrt(jnp.sum(q * q, axis=-1, keepdims=True))
        return conj / norm ** 2

    def calculate_angular_acceleration(self, orientation):
        dt = 1.0 / self.fps
        dq = jnp.zeros_like(orientation)
        dq = dq.at[1:].set((orientation[1:] - orientation[:-1]) / dt)
        dq = dq.at[0].set(dq[1])
        d2q = jnp.zeros_like(orientation)
        d2q = d2q.at[2:].set((dq[2:] - dq[:-2]) / dt)
        inv = self.quaternion_inverse(orientation)
        temp = self.quaternion_multiply(dq, inv)
        velocity = 2.0 * temp
        acceleration = 2.0 * (self.quaternion_multiply(d2q, inv) -
                              self.quaternion_multiply(temp, temp))
        return acceleration, velocity

    def calculate_angle_acc_smooth_loss_total(self, body_poses_total):
        total = jnp.float32(0.0)
        for bone_idx in self.extremities_index_21:
            orientation = jnp.stack(
                [self.get_quat_from_rodrigues(bp.reshape(-1, 3)[bone_idx])
                 for bp in body_poses_total])
            acc, _ = self.calculate_angular_acceleration(orientation)
            sq = jnp.sqrt(jnp.sum(acc * acc, axis=1))
            total = total + jnp.sum(sq[:self.frame_num]) / self.frame_num
        return total / len(self.extremities_index_21)

    def calculate_verts_vel_smooth_loss_total(self, total_verts):
        s = jnp.float32(0.0)
        for i in range(1, len(total_verts)):
            vel = (total_verts[i] - total_verts[i - 1]) * self.fps
            s = s + jnp.mean(jnp.sqrt(jnp.sum(vel * vel, axis=-1)))
        return s / len(total_verts)

    def calculate_joints_smooth_loss_total(self, joints_total):
        s = jnp.float32(0.0)
        for i in range(1, len(joints_total)):
            s = s + jnp.sum((joints_total[i] - joints_total[i - 1]) ** 2)
        return s / len(joints_total)

    # -------------------- forward --------------------
    def forward(self, total_vertices, total_body_pose, total_lh_pose,
                total_rh_pose, total_joints):
        F = len(total_vertices)
        keys = ['Total', 'Contact', 'Inside', 'Outside', 'Angles',
                'HandContact', 'HandPosePrior', 'BodyPosePrior']
        loss_dict_total = {k: jnp.float32(0.0)
                           for k in keys + ['SmoothAngle', 'SmoothVerts',
                                            'SmoothJoints']}

        # One batched Pallas launch covers all frames and both query sets
        # (hand verts + downsampled verts); torch casts to fp16 before the
        # contact-module queries, cast once here.
        verts_all = jnp.concatenate(total_vertices, axis=0)       # (F, NV, 3)
        verts_cast = verts_all.astype(jnp.float16).astype(jnp.float32)
        queries = verts_cast[:, self._fwd_query_ids, :]
        dmin_all, idx_all = pallas_min_dist_batched(queries, verts_cast,
                                                    self._fwd_mask_T,
                                                    with_argmin=True)
        # Vertex normals batched across frames (vmapped scatter-add).
        vn_all = jax.vmap(
            lambda v: compute_vertex_normals(v[None], self.faces)[0])(verts_all)
        hn = int(self.hand_contact_prior.shape[0])

        selfcontact_loss = jnp.float32(0.0)
        for idx in range(F):
            sc_loss, d = self.single_forward(
                idx, total_vertices[idx], verts_cast[idx], vn_all[idx],
                total_body_pose[idx], total_lh_pose[idx], total_rh_pose[idx],
                dmin_all[idx, :hn], dmin_all[idx, hn:], idx_all[idx, hn:])
            selfcontact_loss = selfcontact_loss + sc_loss
            for k in d:
                loss_dict_total[k] = loss_dict_total[k] + d[k]
        selfcontact_loss = selfcontact_loss / F
        for k in keys:
            loss_dict_total[k] = loss_dict_total[k] / F

        smooth_angle = jnp.float32(0.0)
        smooth_verts = jnp.float32(0.0)
        smooth_joints = jnp.float32(0.0)
        if self.smooth_angle_weight > 0 and F > 1:
            smooth_angle = self.smooth_angle_weight * \
                self.calculate_angle_acc_smooth_loss_total(total_body_pose)
        if self.smooth_verts_weight > 0 and F > 1:
            smooth_verts = self.smooth_verts_weight * \
                self.calculate_verts_vel_smooth_loss_total(total_vertices)
        if self.smooth_joints_weight > 0 and F > 1:
            joints55 = [j[:, :55, :] for j in total_joints]
            smooth_joints = self.smooth_joints_weight * \
                self.calculate_joints_smooth_loss_total(joints55)
        loss_dict_total['SmoothAngle'] = smooth_angle
        loss_dict_total['SmoothVerts'] = smooth_verts
        loss_dict_total['SmoothJoints'] = smooth_joints

        loss = selfcontact_loss + smooth_angle + smooth_verts + smooth_joints
        return loss, loss_dict_total


# --------------------------------------------------------------------------
if __name__ == "__main__":
    key = jax.random.PRNGKey(0)
    NV, NF, F = 256, 384, 3                       # vertices, faces, frames
    keys = jax.random.split(key, 10)

    base_verts = jax.random.uniform(keys[0], (1, NV, 3),
                                    minval=-0.1, maxval=0.1, dtype=jnp.float32)
    geod = jax.random.uniform(keys[1], (NV, NV), dtype=jnp.float32)
    geod = (geod + geod.T) * 0.5 * (1.0 - jnp.eye(NV))
    faces = jax.random.randint(keys[2], (NF, 3), 0, NV, dtype=jnp.int32)
    ds = jnp.arange(0, NV, 4, dtype=jnp.int32)                  # 64 ds verts
    hand_ids = jnp.arange(200, 232, dtype=jnp.int32)            # 16 L + 16 R
    hand_w = jax.random.uniform(keys[3], (32,), dtype=jnp.float32)

    total_vertices = [base_verts + 0.002 * jax.random.normal(keys[4 + i],
                                                             (1, NV, 3))
                      for i in range(F)]
    total_body_pose = [0.1 * jax.random.normal(jax.random.fold_in(keys[7], i),
                                               (1, 63)) for i in range(F)]
    total_lh_pose = [0.1 * jax.random.normal(jax.random.fold_in(keys[8], i),
                                             (1, 12)) for i in range(F)]
    total_rh_pose = [0.1 * jax.random.normal(jax.random.fold_in(keys[8],
                                                                100 + i),
                                             (1, 12)) for i in range(F)]
    total_joints = [0.1 * jax.random.normal(jax.random.fold_in(keys[9], i),
                                            (1, 60, 3)) for i in range(F)]

    init_poses = jnp.stack(total_body_pose)       # (F, 1, 63)
    init_verts = jnp.stack(total_vertices)        # (F, 1, NV, 3)

    loss_mod = SelfContactOptiAnimAssignLossPallas(
        geodist=geod, faces=faces, ds=ds,
        hand_contact_prior=hand_ids, hand_contact_prior_weights=hand_w,
        inside_loss_weight=0.5, outside_loss_weight=0.01,
        contact_loss_weight=1.0, hand_contact_prior_weight=1.0,
        pose_prior_weight=0.001, hand_pose_prior_weight=0.001,
        angle_weight=0.1, smooth_angle_weight=0.1, smooth_joints_weight=0.01,
        smooth_verts_weight=0.01, fps=30, frame_num=F)
    loss_mod.configure(init_poses, init_verts)

    # ---- correctness check of the Pallas min-dist against a pure-JAX ref ----
    v0 = total_vertices[0].astype(jnp.float16).astype(jnp.float32)[0]
    q_ids = loss_mod._fwd_query_ids
    q0 = v0[q_ids]
    dmin_k, idx_k = pallas_min_dist_batched(q0[None], v0[None],
                                            loss_mod._fwd_mask_T)
    dmin_na = pallas_min_dist_batched(q0[None], v0[None],
                                      loss_mod._fwd_mask_T, with_argmin=False)
    d2_ref = jnp.sum((q0[:, None, :] - v0[None, :, :]) ** 2, axis=-1)
    d2_ref = jnp.where(loss_mod._fwd_mask_T.T != 0, 1e30, d2_ref)
    dmin_ref = jnp.sqrt(jnp.minimum(jnp.min(d2_ref, axis=1), 1e12))
    assert jnp.allclose(dmin_k[0], dmin_ref, atol=1e-3), "min-dist mismatch"
    assert jnp.allclose(dmin_na[0], dmin_ref, atol=1e-3), "no-argmin mismatch"
    assert bool(jnp.all((idx_k >= 0) & (idx_k < NV))), "argmin out of range"

    loss, loss_dict = loss_mod.forward(total_vertices, total_body_pose,
                                       total_lh_pose, total_rh_pose,
                                       total_joints)
    jax.block_until_ready(loss)
    assert bool(jnp.isfinite(loss)), "loss is not finite"
    print("KERNEL_OK")
</pallas_src>

<mosaic_0001>
module attributes {stable_mosaic.version = 11 : i64} {
  func.func @kernel(%arg0: i32, %arg1: i32, %arg2: i32, %arg3: memref<1x256x8xf32, #tpu.memory_space<vmem>>, %arg4: memref<1x8x256xf32, #tpu.memory_space<vmem>>, %arg5: memref<256x256xi8, #tpu.memory_space<vmem>>, %arg6: memref<1x1x256xf32, #tpu.memory_space<vmem>>) attributes {dimension_semantics = [#tpu.dimension_semantics<parallel>, #tpu.dimension_semantics<parallel>, #tpu.dimension_semantics<arbitrary>], iteration_bounds = array<i64: 3, 1, 1>, scalar_prefetch = 0 : i64, scratch_operands = 0 : i64, tpu.core_type = #tpu.core_type<tc>, window_params = [{transform_indices = @transform_0, window_bounds = array<i64: 1, 256, 8>}, {transform_indices = @transform_1, window_bounds = array<i64: 1, 8, 256>}, {transform_indices = @transform_2, window_bounds = array<i64: 256, 256>}, {transform_indices = @transform_3, window_bounds = array<i64: 1, 1, 256>}]} {
    %c0_i32 = arith.constant 0 : i32
    %0 = arith.cmpi eq, %arg2, %c0_i32 : i32
    %1 = arith.extui %0 : i1 to i32
    %c0_i32_0 = arith.constant 0 : i32
    %2 = arith.cmpi ne, %1, %c0_i32_0 : i32
    scf.if %2 {
      %cst_19 = arith.constant 1.000000e+30 : f32
      %26 = vector.broadcast %cst_19 : f32 to vector<1x1x256xf32>
      %c0_20 = arith.constant 0 : index
      %c0_21 = arith.constant 0 : index
      %c0_22 = arith.constant 0 : index
      %27 = vector.load %arg6[%c0_20, %c0_21, %c0_22] : memref<1x1x256xf32, #tpu.memory_space<vmem>>, vector<1x1x256xf32>
      tpu.vector_store %arg6[%c0_20, %c0_21, %c0_22], %26 {strides = array<i32>} : memref<1x1x256xf32, #tpu.memory_space<vmem>>, vector<1x1x256xf32>,
    } else {
    }
    %c0 = arith.constant 0 : index
    %c0_1 = arith.constant 0 : index
    %3 = vector.load %arg5[%c0, %c0_1] : memref<256x256xi8, #tpu.memory_space<vmem>>, vector<256x256xi8>
    %c0_i8 = arith.constant 0 : i8
    %4 = vector.broadcast %c0_i8 : i8 to vector<256x256xi8>
    %5 = arith.cmpi ne, %3, %4 : vector<256x256xi8>
    %c0_2 = arith.constant 0 : index
    %c0_3 = arith.constant 0 : index
    %c0_4 = arith.constant 0 : index
    %6 = vector.load %arg3[%c0_2, %c0_3, %c0_4] : memref<1x256x8xf32, #tpu.memory_space<vmem>>, vector<1x256x8xf32>
    %7 = vector.shape_cast %6 : vector<1x256x8xf32> to vector<256x8xf32>
    %c0_5 = arith.constant 0 : index
    %c0_6 = arith.constant 0 : index
    %c0_7 = arith.constant 0 : index
    %8 = vector.load %arg4[%c0_5, %c0_6, %c0_7] : memref<1x8x256xf32, #tpu.memory_space<vmem>>, vector<1x8x256xf32>
    %9 = vector.shape_cast %8 : vector<1x8x256xf32> to vector<8x256xf32>
    %cst = arith.constant dense<0.000000e+00> : vector<256x256xf32>
    %10 = tpu.matmul %7, %9, %cst {dimension_numbers = #tpu.dot_dimension_numbers<[1], [0], [0], [1], [0, 0, 1, 1], [], []>, precision = #tpu.contract_precision<fp32>} : vector<256x8xf32>, vector<8x256xf32>, vector<256x256xf32> -> vector<256x256xf32>
    %cst_8 = arith.constant 0.000000e+00 : f32
    %11 = vector.broadcast %cst_8 : f32 to vector<256x256xf32>
    %12 = arith.maximumf %10, %11 : vector<256x256xf32>
    %cst_9 = arith.constant 1.000000e+30 : f32
    %13 = vector.broadcast %cst_9 : f32 to vector<256x256xf32>
    %14 = arith.select %5, %13, %12 : vector<256x256xi1>, vector<256x256xf32>
    %cst_10 = arith.constant dense<0x7F800000> : vector<256xf32>
    %15 = vector.multi_reduction <minimumf>, %14, %cst_10 [0] : vector<256x256xf32> to vector<256xf32>
    %16 = vector.shape_cast %15 : vector<256xf32> to vector<1x256xf32>
    %c0_11 = arith.constant 0 : index
    %c0_12 = arith.constant 0 : index
    %c0_13 = arith.constant 0 : index
    %17 = vector.load %arg6[%c0_11, %c0_12, %c0_13] : memref<1x1x256xf32, #tpu.memory_space<vmem>>, vector<1x1x256xf32>
    %18 = vector.shape_cast %17 : vector<1x1x256xf32> to vector<1x256xf32>
    %19 = arith.minimumf %16, %18 : vector<1x256xf32>
    %c0_14 = arith.constant 0 : index
    %c0_15 = arith.constant 0 : index
    %c0_16 = arith.constant 0 : index
    %20 = vector.load %arg6[%c0_14, %c0_15, %c0_16] : memref<1x1x256xf32, #tpu.memory_space<vmem>>, vector<1x1x256xf32>
    %21 = vector.shape_cast %20 : vector<1x1x256xf32> to vector<1x256xf32>
    %22 = vector.shape_cast %19 : vector<1x256xf32> to vector<1x1x256xf32>
    tpu.vector_store %arg6[%c0_14, %c0_15, %c0_16], %22 {strides = array<i32>} : memref<1x1x256xf32, #tpu.memory_space<vmem>>, vector<1x1x256xf32>,
    %c0_i32_17 = arith.constant 0 : i32
    %23 = arith.cmpi eq, %arg2, %c0_i32_17 : i32
    %24 = arith.extui %23 : i1 to i32
    %c0_i32_18 = arith.constant 0 : i32
    %25 = arith.cmpi ne, %24, %c0_i32_18 : i32
    scf.if %25 {
      %c0_19 = arith.constant 0 : index
      %c0_20 = arith.constant 0 : index
      %c0_21 = arith.constant 0 : index
      %26 = vector.load %arg6[%c0_19, %c0_20, %c0_21] : memref<1x1x256xf32, #tpu.memory_space<vmem>>, vector<1x1x256xf32>
      %cst_22 = arith.constant 9.99999995E+11 : f32
      %27 = vector.broadcast %cst_22 : f32 to vector<1x1x256xf32>
      %28 = arith.minimumf %26, %27 : vector<1x1x256xf32>
      %29 = math.sqrt %28 : vector<1x1x256xf32>
      %c0_23 = arith.constant 0 : index
      %c0_24 = arith.constant 0 : index
      %c0_25 = arith.constant 0 : index
      %30 = vector.load %arg6[%c0_23, %c0_24, %c0_25] : memref<1x1x256xf32, #tpu.memory_space<vmem>>, vector<1x1x256xf32>
      tpu.vector_store %arg6[%c0_23, %c0_24, %c0_25], %29 {strides = array<i32>} : memref<1x1x256xf32, #tpu.memory_space<vmem>>, vector<1x1x256xf32>,
    } else {
    }
    return
  }
  func.func @transform_0(%arg0: i32, %arg1: i32, %arg2: i32) -> (i32, i32, i32) {
    %c0_i32 = arith.constant 0 : i32
    %c0_i32_0 = arith.constant 0 : i32
    return %arg0, %arg2, %c0_i32 : i32, i32, i32
  }
  func.func @transform_1(%arg0: i32, %arg1: i32, %arg2: i32) -> (i32, i32, i32) {
    %c0_i32 = arith.constant 0 : i32
    %c0_i32_0 = arith.constant 0 : i32
    return %arg0, %c0_i32, %arg1 : i32, i32, i32
  }
  func.func @transform_2(%arg0: i32, %arg1: i32, %arg2: i32) -> (i32, i32) {
    %c0_i32 = arith.constant 0 : i32
    return %arg2, %arg1 : i32, i32
  }
  func.func @transform_3(%arg0: i32, %arg1: i32, %arg2: i32) -> (i32, i32, i32) {
    %c0_i32 = arith.constant 0 : i32
    %c0_i32_0 = arith.constant 0 : i32
    return %arg0, %c0_i32, %arg1 : i32, i32, i32
  }
}

</mosaic_0001>

<bundles_post_ra>
// kernel: tpu_custom_call.1
= control target key start
LH: loop header
LB: loop body
LE: loop exit
PB: predicated region body
PF: predicated region fallthrough
CT: control target
= control target key end

     0   :  { %8 = vsyncpa [#allocation3], 0  ;;  %s5329_s0 = inlined_call_operand.vmem [shape: f32[3,256,8], index: 0, kind: input, shape index: {}]   ;;  %s5330_s1 = inlined_call_operand.vmem [shape: f32[3,8,256], index: 1, kind: input, shape index: {}]   ;;  %s5331_s2 = inlined_call_operand.vmem [shape: s8[256,256], index: 2, kind: input, shape index: {}]   ;;  %s5332_s3 = inlined_call_operand.hbm [shape: f32[3,1,256], index: 3, kind: output, shape index: {}]  }
   0x1   :  { %10 = vsyncpa [#allocation3 + $0x1], 0  ;;  %s3670_s12 = smov 0   ;;  %s3672_s13 = smov 0  }
   0x2   :  { %s3674_s14 = smov 0   ;;  %s3676_s15 = smov 0  }
   0x3   :  { %s3678_s16 = smov 0   ;;  %s3680_s17 = smov 0  }
   0x4 LB: > { %s3165_s18 = sadd.s32 4294967295, %s3643_s17   ;;  %s3166_s19 = sadd.s32 4294967294, %s3643_s17   ;;  %s3643_s17 = sphi %s3680_s17, %s16_s17   ;;  %s3639_s16 = sphi %s3678_s16, %s5542_s16   ;;  %s3635_s15 = sphi %s3676_s15, %s5541_s15   ;;  %s3631_s14 = sphi %s3674_s14, %s5540_s14   ;;  %s3627_s13 = sphi %s3672_s13, %s5539_s13   ;;  %s3623_s12 = sphi %s3670_s12, %s5538_s12  }
   0x5   : > { %s35_s20 = sadd.s32 1, %s3639_s16  ;;  %s128_s21 = sadd.s32 1, %s3631_s14 }
   0x6   : > { %p37_p0 = scmp.ge.s32.totalorder %s35_s20, 3  ;;  %p138_p1 = scmp.ne.s32.totalorder %s3631_s14, %s3627_s13 }
   0x7   : > { %p139_p2 = scmp.eq.s32.totalorder %s3165_s18, 2  ;;  %p144_p3 = scmp.ne.s32.totalorder %s3627_s13, %s3623_s12 }
   0x8   : > { %s5544_s20 = smov (%p37_p0, %s35_s20), 0  ;;  %p145_p5 = scmp.eq.s32.totalorder %s3166_s19, 2 }
   0x9   : > { %p3710_p4 = por %p139_p2, %p138_p1  ;;  %s123_s23 = ssub.s32 %s3639_s16, %s5544_s20 }
   0xa   : > { %p3170_p6 = scmp.ge.s32.totalorder %s3643_s17, 1  ;;  %p126_p7 = scmp.eq.s32.totalorder %s123_s23, 0 }
   0xb   : > { %p3717_p8 = por %p145_p5, %p144_p3  ;;  %p204_p9 = scmp.lt.s32.totalorder %s3643_s17, 4 }
   0xc   : > { %s3723_s25 = scalar_select %p126_p7, %s3631_s14, %s128_s21  }
   0xd   : > { %p205_p10 = pnand %p3170_p6, %p204_p9 }
   0xf   : > { %208 = sbr.rel (%p205_p10) target bundleno = 702 (0x2be), region = 32 }
  0x16   : > { %p252_p11 = scmp.lt.s32.totalorder %s3635_s15, 2  ;;  %v3645_v0 = vmov 0.0   ;;  %vm361_vm0 = vcmask 64512   ;;  %s3183_s11 = sshll.u32 %s3635_s15, 5 }
  0x17   : > { %1567 = vmatprep.mubr.f32.mxu0 %v3645_v0  ;;  %524 = vmatprep.mubr.f32.mxu1 %v3645_v0  ;;  %s5277_s23 = scalar_lea.hbm %s5332_s3, %s3183_s11 }
  0x18   : > { %s253_s26 = scalar_select %p252_p11, %s3635_s15, 2 }
  0x1a   : > { %s3181_s27 = sshll.u32 %s253_s26, 8  ;;  %s3182_s28 = sshll.u32 %s253_s26, 4 }
  0x1b   : > { %s3732_s4 = scalar_lea.vmem %s5329_s0, %s3181_s27  ;;  %s269_s7 = scalar_lea.vmem %s5330_s1, %s3182_s28 }
  0x1c   : > { %v360_v1 = vld [vmem:[%s269_s7 + $0x8] sm:$0xff]  ;;  %v359_v2 = vld [vmem:[%s269_s7] sm:$0xff]  ;;  %v329_v8 = vld [vmem:[%s3732_s4 + $0x10] sm:$0xff]  ;;  %s248_s7 = sand.u32 1, %s3627_s13   ;;  %s3649_s27 = smov [#allocation2]  }
  0x1d   : > { %v327_v3 = vld [vmem:[%s3732_s4] sm:$0xff]  ;;  %v458_v4 = vand.u32 4294901760, %v360_v1  ;;  %v3738_v5 = vand.u32 4294901760, %v359_v2  ;;  %v328_v7 = vld [vmem:[%s3732_s4 + $0x8] sm:$0xff]  ;;  %v330_v9 = vld [vmem:[%s3732_s4 + $0x18] sm:$0xff]  ;;  %v369_v12 = vsel %vm361_vm0, %v329_v8, 0 }
  0x1e   : > { %v363_v6 = vsel %vm361_vm0, %v327_v3, 0  ;;  %v366_v11 = vsel %vm361_vm0, %v328_v7, 0  ;;  %v372_v13 = vsel %vm361_vm0, %v330_v9, 0  ;;  %v331_v14 = vld [vmem:[%s3732_s4 + $0x20] sm:$0xff]  ;;  %v3755_v18 = vand.u32 4294901760, %v369_v12  ;;  %v332_v26 = vld [vmem:[%s3732_s4 + $0x28] sm:$0xff] }
  0x1f   : > { %v3744_v10 = vand.u32 4294901760, %v363_v6  ;;  %1502 = vmatprep.subr.mxu0 %v458_v4  ;;  %v3751_v15 = vsub.f32 %v359_v2, %v3738_v5  ;;  %459 = vmatprep.subr.mxu1 %v458_v4  ;;  %v878_v16 = vsub.f32 %v360_v1, %v458_v4  ;;  %v3753_v17 = vand.u32 4294901760, %v366_v11  ;;  %v333_v40 = vld [vmem:[%s3732_s4 + $0x30] sm:$0xff]  ;;  %v334_v47 = vld [vmem:[%s3732_s4 + $0x38] sm:$0xff]  ;;  %v335_v54 = vld [vmem:[%s3732_s4 + $0x40] sm:$0xff]  ;;  %s3171_s8 = sshll.u32 %s248_s7, 1 }
  0x20   : > { %1504 = vmatpush1.msra.mxu0 %v3738_v5  ;;  %461 = vmatpush1.msra.mxu1 %v3738_v5  ;;  %v3762_v20 = vand.u32 4294901760, %v372_v13  ;;  %v375_v21 = vsel %vm361_vm0, %v331_v14, 0  ;;  %v3770_v25 = vsub.f32 %v369_v12, %v3755_v18  ;;  %v378_v35 = vsel %vm361_vm0, %v332_v26, 0  ;;  %v336_v60 = vld [vmem:[%s3732_s4 + $0x48] sm:$0xff]  ;;  %v343_v62 = vld [vmem:[%s3732_s4 + $0x80] sm:$0xff]  ;;  %s4553_s9 = scalar_lea.vmem [#allocation2], %s3171_s8 }
  0x21   : > { %v3759_v19 = vsub.f32 %v363_v6, %v3744_v10  ;;  %v879_v22 = vand.u32 4294901760, %v878_v16  ;;  %v885_v23 = vand.u32 4294901760, %v3751_v15  ;;  %v3767_v24 = vsub.f32 %v366_v11, %v3753_v17  ;;  %v344_v3 = vld [vmem:[%s3732_s4 + $0x88] sm:$0xff]  ;;  %v346_v6 = vld [vmem:[%s3732_s4 + $0x98] sm:$0xff]  ;;  %v337_v11 = vld [vmem:[%s3732_s4 + $0x50] sm:$0xff]  ;;  %s3047_s18 = sshll.u32 %s4553_s9, 4  ;;  %s5279_s18 = int_to_ptr.vmem [resolvable:$true] %s3047_s18 }
  0x22   : > { %v3776_v31 = vand.u32 4294901760, %v375_v21  ;;  %v549_v33 = vand.u32 4294901760, %v3770_v25  ;;  %v3781_v34 = vsub.f32 %v372_v13, %v3762_v20  ;;  %v3790_v42 = vand.u32 4294901760, %v378_v35  ;;  %v347_v13 = vld [vmem:[%s3732_s4 + $0xa0] sm:$0xff]  ;;  %s3031_s15 = scalar_lea.sflag [#allocation3], %s248_s7  ;;  %s3565_s26 = scalar_lea.vmem %s5279_s18, 32 }
  0x23   : > { %v527_v27 = vand.u32 4294901760, %v3759_v19  ;;  %v880_v28 = vsub.f32 %v878_v16, %v879_v22  ;;  %1859 = vmatprep.subr.mxu0 %v879_v22  ;;  %v886_v29 = vsub.f32 %v3751_v15, %v885_v23  ;;  %v538_v30 = vand.u32 4294901760, %v3767_v24  ;;  %p3566_p12 = scmp.ne.s32.totalorder %s5279_s18, %s3565_s26  ;;  %s3569_s28 = sshll.u32 %s3649_s27, 4  ;;  %s3570_s28 = int_to_ptr.vmem [resolvable:$false] %s3569_s28 }
  0x24   : > { %v3788_v41 = vsub.f32 %v375_v21, %v3776_v31  ;;  %v550_v44 = vsub.f32 %v3770_v25, %v549_v33  ;;  %v560_v45 = vand.u32 4294901760, %v3781_v34  ;;  %v381_v46 = vsel %vm361_vm0, %v333_v40, 0  ;;  %s3571_s29 = scalar_lea.vmem %s3570_s28, 64  ;;  %p3572_p1 = scmp.lt.s32.totalorder %s5279_s18, %s3570_s28 }
  0x25   : > { %1571 = vmatmul.mubr.f32.vlgmr.msra.gmra.mrb[0].mxu0 %v527_v27  ;;  %v528_v32 = vsub.f32 %v3759_v19, %v527_v27  ;;  %v881_v36 = vand.u32 4294901760, %v880_v28  ;;  %v887_v37 = vand.u32 4294901760, %v886_v29  ;;  %v539_v38 = vsub.f32 %v3767_v24, %v538_v30  ;;  %v348_v27 = vld [vmem:[%s3732_s4 + $0xa8] sm:$0xff]  ;;  %p3567_p13 = pnand %p3566_p12, %p3710_p4  ;;  %p3573_p2 = scmp.lt.s32.totalorder %s3571_s29, %s3565_s26 }
  0x26   : > { %1576 = vmatprep.mubr.f32.mxu0 %v3645_v0  ;;  %1863 = vmatpush1.msra.mxu0 %v885_v23  ;;  %v571_v48 = vand.u32 4294901760, %v3788_v41  ;;  %v3800_v49 = vsub.f32 %v378_v35, %v3790_v42  ;;  %v551_v50 = vand.u32 4294901760, %v550_v44  ;;  %v561_v51 = vsub.f32 %v3781_v34, %v560_v45 }
  0x27   : > { %v529_v39 = vand.u32 4294901760, %v528_v32  ;;  %2152 = vmatprep.subr.mxu0 %v458_v4  ;;  %882 = vmatprep.subr.mxu1 %v881_v36  ;;  %v540_v43 = vand.u32 4294901760, %v539_v38  ;;  %v3803_v52 = vand.u32 4294901760, %v381_v46  ;;  %v384_v53 = vsel %vm361_vm0, %v334_v47, 0  ;;  %v345_v4 = vld [vmem:[%s3732_s4 + $0x90] sm:$0xff]  ;;  %v338_v32 = vld [vmem:[%s3732_s4 + $0x58] sm:$0xff]  ;;  %p3568_p0 = pneg %p3567_p13  ;;  %p3574_p3 = por %p3573_p2, %p3572_p1 }
  0x28   : > { %v572_v55 = vsub.f32 %v3788_v41, %v571_v48  ;;  %v582_v56 = vand.u32 4294901760, %v3800_v49  ;;  %v562_v57 = vand.u32 4294901760, %v561_v51  ;;  %v3814_v59 = vand.u32 4294901760, %v384_v53  ;;  %v349_v36 = vld [vmem:[%s3732_s4 + $0xb0] sm:$0xff]  ;;  %v339_v47 = vld [vmem:[%s3732_s4 + $0x60] sm:$0xff] }
  0x29   : > { %530 = vmatmul.mubr.f32.vlgmr.msra.gmra.mrb[0].mxu1 %v529_v39  ;;  %1580 = vmatmul.mubr.f32.gmra.mrb[2].mxu0 %v538_v30  ;;  %v3812_v58 = vsub.f32 %v381_v46, %v3803_v52  ;;  %v387_v61 = vsel %vm361_vm0, %v335_v54, 0  ;;  %v390_v2 = vsel %vm361_vm0, %v336_v60, 0  ;;  %v3834_v12 = vsel %vm361_vm0, %v343_v62, 0  ;;  %v351_v46 = vld [vmem:[%s3732_s4 + $0xc0] sm:$0xff]  ;;  %p3575_p5 = pnand %p3574_p3, %p3568_p0 }
  0x2a   : > { %888 = vmatpush1.msra.mxu1 %v887_v37  ;;  %535 = vmatprep.mubr.f32.mxu1 %v3645_v0  ;;  %v573_v63 = vand.u32 4294901760, %v572_v55  ;;  %v583_v1 = vsub.f32 %v3800_v49, %v582_v56  ;;  %v3828_v8 = vsub.f32 %v384_v53, %v3814_v59  ;;  %v3830_v9 = vand.u32 4294901760, %v387_v61 }
  0x2b   : > { %1585 = vmatprep.mubr.f32.mxu0 %v3645_v0  ;;  %1178 = vmatprep.subr.mxu1 %v878_v16  ;;  %v593_v7 = vand.u32 4294901760, %v3812_v58  ;;  %v3840_v14 = vsel %vm361_vm0, %v344_v3, 0  ;;  %v3843_v16 = vsel %vm361_vm0, %v345_v4, 0  ;;  %v3846_v21 = vsel %vm361_vm0, %v346_v6, 0  ;;  %v340_v3 = vld [vmem:[%s3732_s4 + $0x68] sm:$0xff] }
  0x2c   : > { %v584_v22 = vand.u32 4294901760, %v583_v1  ;;  %v3848_v23 = vand.u32 4294901760, %v390_v2  ;;  %v393_v26 = vsel %vm361_vm0, %v337_v11, 0  ;;  %v604_v29 = vand.u32 4294901760, %v3828_v8  ;;  %v354_v1 = vld [vmem:[%s3732_s4 + $0xd8] sm:$0xff] }
  0x2d   : > { %541 = vmatmul.mubr.f32.gmra.mrb[2].mxu1 %v540_v43  ;;  %1589 = vmatmul.mubr.f32.gmra.mrb[4].mxu0 %v549_v33  ;;  %v594_v28 = vsub.f32 %v3812_v58, %v593_v7  ;;  %v3855_v30 = vsub.f32 %v387_v61, %v3830_v9  ;;  %v3859_v33 = vsel %vm361_vm0, %v347_v13, 0  ;;  %v3864_v35 = vsel %vm361_vm0, %v348_v27, 0  ;;  %v356_v13 = vld [vmem:[%s3732_s4 + $0xe8] sm:$0xff] }
  0x2e   : > { %546 = vmatprep.mubr.f32.mxu1 %v3645_v0  ;;  %1594 = vmatprep.mubr.f32.mxu0 %v3645_v0  ;;  %v3867_v37 = vand.u32 4294901760, %v393_v26  ;;  %v396_v38 = vsel %vm361_vm0, %v338_v32, 0  ;;  %v605_v40 = vsub.f32 %v3828_v8, %v604_v29  ;;  %v3873_v44 = vsub.f32 %v390_v2, %v3848_v23  ;;  %v355_v2 = vld [vmem:[%s3732_s4 + $0xe0] sm:$0xff]  ;;  %v341_v32 = vld [vmem:[%s3732_s4 + $0x70] sm:$0xff] }
  0x2f   : > { %v595_v39 = vand.u32 4294901760, %v594_v28  ;;  %v615_v43 = vand.u32 4294901760, %v3855_v30  ;;  %v3887_v53 = vand.u32 4294901760, %v396_v38  ;;  %v3893_v55 = vsel %vm361_vm0, %v351_v46, 0 }
  0x30   : > { %v3885_v51 = vsub.f32 %v393_v26, %v3867_v37  ;;  %v626_v61 = vand.u32 4294901760, %v3873_v44  ;;  %v399_v62 = vsel %vm361_vm0, %v339_v47, 0  ;;  %v3919_v27 = vsel %vm361_vm0, %v354_v1, 0  ;;  %v358_v47 = vld [vmem:[%s3732_s4 + $0xf8] sm:$0xff] }
  0x31   : > { %552 = vmatmul.mubr.f32.gmra.mrb[4].mxu1 %v551_v50  ;;  %1598 = vmatmul.mubr.f32.gmra.mrb[6].mxu0 %v560_v45  ;;  %v350_v45 = vld [vmem:[%s3732_s4 + $0xb8] sm:$0xff]  ;;  %v352_v50 = vld [vmem:[%s3732_s4 + $0xc8] sm:$0xff]  ;;  %v616_v60 = vsub.f32 %v3855_v30, %v615_v43  ;;  %v3914_v11 = vand.u32 4294901760, %v399_v62  ;;  %v3922_v28 = vsel %vm361_vm0, %v355_v2, 0 }
  0x32   : > { %557 = vmatprep.mubr.f32.mxu1 %v3645_v0  ;;  %1603 = vmatprep.mubr.f32.mxu0 %v3645_v0  ;;  %v3890_v54 = vsel %vm361_vm0, %v350_v45, 0  ;;  %v637_v6 = vand.u32 4294901760, %v3885_v51  ;;  %v627_v26 = vsub.f32 %v3873_v44, %v626_v61 }
  0x35   : > { %563 = vmatmul.mubr.f32.gmra.mrb[6].mxu1 %v562_v57  ;;  %1607 = vmatmul.mubr.f32.gmra.mrb[8].mxu0 %v571_v48  ;;  %v3881_v48 = vsel %vm361_vm0, %v349_v36, 0  ;;  %v606_v57 = vand.u32 4294901760, %v605_v40  ;;  %v3929_v36 = vsel %vm361_vm0, %v356_v13, 0  ;;  %v628_v40 = vand.u32 4294901760, %v627_v26 }
  0x36   : > { %568 = vmatprep.mubr.f32.mxu1 %v3645_v0  ;;  %1612 = vmatprep.mubr.f32.mxu0 %v3645_v0 }
  0x39   : > { %574 = vmatmul.mubr.f32.gmra.mrb[8].mxu1 %v573_v63  ;;  %1616 = vmatmul.mubr.f32.gmra.mrb[10].mxu0 %v582_v56  ;;  %v353_v56 = vld [vmem:[%s3732_s4 + $0xd0] sm:$0xff]  ;;  %v3902_v63 = vsel %vm361_vm0, %v352_v50, 0  ;;  %v405_v50 = vsel %vm361_vm0, %v341_v32, 0 }
  0x3a   : > { %579 = vmatprep.mubr.f32.mxu1 %v3645_v0  ;;  %1621 = vmatprep.mubr.f32.mxu0 %v3645_v0  ;;  %v3908_v4 = vsel %vm361_vm0, %v353_v56, 0 }
  0x3d   : > { %585 = vmatmul.mubr.f32.gmra.mrb[10].mxu1 %v584_v22  ;;  %1625 = vmatmul.mubr.f32.gmra.mrb[12].mxu0 %v593_v7  ;;  %v3912_v7 = vsub.f32 %v396_v38, %v3887_v53  ;;  %v617_v22 = vand.u32 4294901760, %v616_v60  ;;  %v357_v38 = vld [vmem:[%s3732_s4 + $0xf0] sm:$0xff] }
  0x3e   : > { %590 = vmatprep.mubr.f32.mxu1 %v3645_v0  ;;  %1630 = vmatprep.mubr.f32.mxu0 %v3645_v0  ;;  %v3944_v56 = vsel %vm361_vm0, %v357_v38, 0  ;;  %v3970_v38 = vand.u32 4294901760, %v3834_v12 }
  0x3f   : > { %v648_v45 = vand.u32 4294901760, %v3912_v7 }
  0x41   : > { %596 = vmatmul.mubr.f32.gmra.mrb[12].mxu1 %v595_v39  ;;  %1634 = vmatmul.mubr.f32.gmra.mrb[14].mxu0 %v604_v29  ;;  %v402_v29 = vsel %vm361_vm0, %v340_v3, 0  ;;  %v3933_v39 = vsub.f32 %v399_v62, %v3914_v11  ;;  %v649_v1 = vsub.f32 %v3912_v7, %v648_v45  ;;  %v3955_v3 = vand.u32 4294901760, %v405_v50 }
  0x42   : > { %601 = vmatprep.mubr.f32.mxu1 %v3645_v0  ;;  %1639 = vmatprep.mubr.f32.mxu0 %v3645_v0  ;;  %v3937_v46 = vand.u32 4294901760, %v402_v29 }
  0x43   : > { %v659_v60 = vand.u32 4294901760, %v3933_v39  ;;  %v650_v26 = vand.u32 4294901760, %v649_v1  ;;  %v3963_v32 = vsub.f32 %v405_v50, %v3955_v3  ;;  %v3981_v50 = vsub.f32 %v3834_v12, %v3970_v38 }
  0x44   : > { %v3953_v2 = vsub.f32 %v402_v29, %v3937_v46  ;;  %v3986_v1 = vand.u32 4294901760, %v3840_v14 }
  0x45   : > { %607 = vmatmul.mubr.f32.gmra.mrb[14].mxu1 %v606_v57  ;;  %1643 = vmatmul.mubr.f32.gmra.mrb[16].mxu0 %v615_v43  ;;  %v638_v43 = vsub.f32 %v3885_v51, %v637_v6  ;;  %v342_v57 = vld [vmem:[%s3732_s4 + $0x78] sm:$0xff]  ;;  %5348 = vst [vmem:[#allocation5_spill] sm:$0xff] %v3981_v50 }
  0x46   : > { %612 = vmatprep.mubr.f32.mxu1 %v3645_v0  ;;  %1648 = vmatprep.mubr.f32.mxu0 %v3645_v0  ;;  %v408_v13 = vsel %vm361_vm0, %v342_v57, 0 }
  0x47   : > { %v639_v62 = vand.u32 4294901760, %v638_v43  ;;  %v3965_v29 = vand.u32 4294901760, %v408_v13 }
  0x49   : > { %618 = vmatmul.mubr.f32.gmra.mrb[16].mxu1 %v617_v22  ;;  %1652 = vmatmul.mubr.f32.gmra.mrb[18].mxu0 %v626_v61  ;;  %v3949_v61 = vsel %vm361_vm0, %v358_v47, 0  ;;  %v660_v22 = vsub.f32 %v3933_v39, %v659_v60  ;;  %v3975_v47 = vsub.f32 %v408_v13, %v3965_v29  ;;  %v3991_v13 = vand.u32 4294901760, %v3843_v16 }
  0x4a   : > { %623 = vmatprep.mubr.f32.mxu1 %v3645_v0  ;;  %1657 = vmatprep.mubr.f32.mxu0 %v3645_v0 }
  0x4d   : > { %629 = vmatmul.mubr.f32.gmra.mrb[18].mxu1 %v628_v40  ;;  %1661 = vmatmul.mubr.f32.gmra.mrb[20].mxu0 %v637_v6  ;;  %v670_v6 = vand.u32 4294901760, %v3953_v2  ;;  %v661_v40 = vand.u32 4294901760, %v660_v22 }
  0x4e   : > { %634 = vmatprep.mubr.f32.mxu1 %v3645_v0  ;;  %1666 = vmatprep.mubr.f32.mxu0 %v3645_v0 }
  0x4f   : > { %v671_v43 = vsub.f32 %v3953_v2, %v670_v6 }
  0x51   : > { %640 = vmatmul.mubr.f32.gmra.mrb[20].mxu1 %v639_v62  ;;  %1670 = vmatmul.mubr.f32.gmra.mrb[22].mxu0 %v648_v45  ;;  %v681_v45 = vand.u32 4294901760, %v3963_v32  ;;  %v672_v57 = vand.u32 4294901760, %v671_v43  ;;  %v692_v62 = vand.u32 4294901760, %v3975_v47 }
  0x52   : > { %645 = vmatprep.mubr.f32.mxu1 %v3645_v0  ;;  %1675 = vmatprep.mubr.f32.mxu0 %v3645_v0 }
  0x53   : > { %v693_v22 = vsub.f32 %v3975_v47, %v692_v62 }
  0x55   : > { %651 = vmatmul.mubr.f32.gmra.mrb[22].mxu1 %v650_v26  ;;  %1679 = vmatmul.mubr.f32.gmra.mrb[24].mxu0 %v659_v60  ;;  %v682_v60 = vsub.f32 %v3963_v32, %v681_v45  ;;  %v703_v26 = vand.u32 4294901760, %v3981_v50  ;;  %v694_v43 = vand.u32 4294901760, %v693_v22 }
  0x56   : > { %656 = vmatprep.mubr.f32.mxu1 %v3645_v0  ;;  %1684 = vmatprep.mubr.f32.mxu0 %v3645_v0 }
  0x57   : > { %v683_v12 = vand.u32 4294901760, %v682_v60  ;;  %v4008_v60 = vsub.f32 %v3843_v16, %v3991_v13 }
  0x59   : > { %662 = vmatmul.mubr.f32.gmra.mrb[24].mxu1 %v661_v40  ;;  %1688 = vmatmul.mubr.f32.gmra.mrb[26].mxu0 %v670_v6  ;;  %v3997_v6 = vsub.f32 %v3840_v14, %v3986_v1  ;;  %v4002_v40 = vand.u32 4294901760, %v3846_v21  ;;  %5350 = vst [vmem:[#allocation7_spill] sm:$0xff] %v4008_v60  ;;  %v725_v22 = vand.u32 4294901760, %v4008_v60 }
  0x5a   : > { %667 = vmatprep.mubr.f32.mxu1 %v3645_v0  ;;  %1693 = vmatprep.mubr.f32.mxu0 %v3645_v0 }
  0x5b   : > { %5349 = vst [vmem:[#allocation6_spill] sm:$0xff] %v3997_v6  ;;  %v4014_v14 = vsub.f32 %v3846_v21, %v4002_v40 }
  0x5d   : > { %673 = vmatmul.mubr.f32.gmra.mrb[26].mxu1 %v672_v57  ;;  %1697 = vmatmul.mubr.f32.gmra.mrb[28].mxu0 %v681_v45  ;;  %v704_v45 = vsub.f32 %v3981_v50, %v703_v26  ;;  %v714_v57 = vand.u32 4294901760, %v3997_v6  ;;  %5351 = vst [vmem:[#allocation8_spill] sm:$0xff] %v4014_v14  ;;  %v4019_v50 = vand.u32 4294901760, %v3859_v33  ;;  %v736_v16 = vand.u32 4294901760, %v4014_v14 }
  0x5e   : > { %678 = vmatprep.mubr.f32.mxu1 %v3645_v0  ;;  %1702 = vmatprep.mubr.f32.mxu0 %v3645_v0 }
  0x61   : > { %684 = vmatmul.mubr.f32.gmra.mrb[28].mxu1 %v683_v12  ;;  %1706 = vmatmul.mubr.f32.gmra.mrb[30].mxu0 %v692_v62  ;;  %v705_v62 = vand.u32 4294901760, %v704_v45  ;;  %v715_v12 = vsub.f32 %v3997_v6, %v714_v57  ;;  %v4030_v45 = vand.u32 4294901760, %v3864_v35  ;;  %v737_v6 = vsub.f32 %v4014_v14, %v736_v16 }
  0x62   : > { %689 = vmatprep.mubr.f32.mxu1 %v3645_v0  ;;  %1711 = vmatprep.mubr.f32.mxu0 %v3645_v0  ;;  %v4057_v14 = vand.u32 4294901760, %v3893_v55 }
  0x63   : > { %v716_v21 = vand.u32 4294901760, %v715_v12  ;;  %v4038_v12 = vsub.f32 %v3864_v35, %v4030_v45  ;;  %v4052_v35 = vand.u32 4294901760, %v3890_v54 }
  0x65   : > { %695 = vmatmul.mubr.f32.gmra.mrb[30].mxu1 %v694_v43  ;;  %1715 = vmatmul.mubr.f32.gmra.mrb[32].mxu0 %v703_v26  ;;  %v726_v43 = vsub.f32 %v4008_v60, %v725_v22  ;;  %v4027_v26 = vsub.f32 %v3859_v33, %v4019_v50  ;;  %5353 = vst [vmem:[#allocation10_spill] sm:$0xff] %v4038_v12  ;;  %v4041_v33 = vand.u32 4294901760, %v3881_v48  ;;  %v738_v60 = vand.u32 4294901760, %v737_v6 }
  0x66   : > { %700 = vmatprep.mubr.f32.mxu1 %v3645_v0  ;;  %1720 = vmatprep.mubr.f32.mxu0 %v3645_v0 }
  0x67   : > { %5352 = vst [vmem:[#allocation9_spill] sm:$0xff] %v4027_v26 }
  0x69   : > { %706 = vmatmul.mubr.f32.gmra.mrb[32].mxu1 %v705_v62  ;;  %1724 = vmatmul.mubr.f32.gmra.mrb[34].mxu0 %v714_v57  ;;  %v727_v62 = vand.u32 4294901760, %v726_v43  ;;  %v747_v57 = vand.u32 4294901760, %v4027_v26  ;;  %v4049_v43 = vsub.f32 %v3881_v48, %v4041_v33  ;;  %v4063_v48 = vsub.f32 %v3890_v54, %v4052_v35 }
  0x6a   : > { %711 = vmatprep.mubr.f32.mxu1 %v3645_v0  ;;  %1729 = vmatprep.mubr.f32.mxu0 %v3645_v0  ;;  %v4079_v54 = vand.u32 4294901760, %v3908_v4 }
  0x6b   : > { %5354 = vst [vmem:[#allocation11_spill] sm:$0xff] %v4049_v43  ;;  %5355 = vst [vmem:[#allocation12_spill] sm:$0xff] %v4063_v48 }
  0x6d   : > { %717 = vmatmul.mubr.f32.gmra.mrb[34].mxu1 %v716_v21  ;;  %1733 = vmatmul.mubr.f32.gmra.mrb[36].mxu0 %v725_v22  ;;  %v748_v21 = vsub.f32 %v4027_v26, %v747_v57  ;;  %v758_v22 = vand.u32 4294901760, %v4038_v12  ;;  %v4068_v26 = vand.u32 4294901760, %v3902_v63 }
  0x6e   : > { %722 = vmatprep.mubr.f32.mxu1 %v3645_v0  ;;  %1738 = vmatprep.mubr.f32.mxu0 %v3645_v0 }
  0x6f   : > { %v749_v6 = vand.u32 4294901760, %v748_v21  ;;  %v780_v21 = vand.u32 4294901760, %v4063_v48 }
  0x71   : > { %728 = vmatmul.mubr.f32.gmra.mrb[36].mxu1 %v727_v62  ;;  %1742 = vmatmul.mubr.f32.gmra.mrb[38].mxu0 %v736_v16  ;;  %v759_v16 = vsub.f32 %v4038_v12, %v758_v22  ;;  %v769_v62 = vand.u32 4294901760, %v4049_v43  ;;  %v4074_v12 = vsub.f32 %v3893_v55, %v4057_v14  ;;  %v4091_v55 = vsub.f32 %v3908_v4, %v4079_v54 }
  0x72   : > { %733 = vmatprep.mubr.f32.mxu1 %v3645_v0  ;;  %1747 = vmatprep.mubr.f32.mxu0 %v3645_v0 }
  0x73   : > { %5356 = vst [vmem:[#allocation13_spill] sm:$0xff] %v4074_v12  ;;  %5358 = vst [vmem:[#allocation15_spill] sm:$0xff] %v4091_v55 }
  0x75   : > { %739 = vmatmul.mubr.f32.gmra.mrb[38].mxu1 %v738_v60  ;;  %1751 = vmatmul.mubr.f32.gmra.mrb[40].mxu0 %v747_v57  ;;  %v760_v60 = vand.u32 4294901760, %v759_v16  ;;  %v770_v57 = vsub.f32 %v4049_v43, %v769_v62  ;;  %v791_v16 = vand.u32 4294901760, %v4074_v12  ;;  %v4085_v43 = vsub.f32 %v3902_v63, %v4068_v26 }
  0x76   : > { %744 = vmatprep.mubr.f32.mxu1 %v3645_v0  ;;  %1756 = vmatprep.mubr.f32.mxu0 %v3645_v0  ;;  %v4101_v63 = vand.u32 4294901760, %v3922_v28 }
  0x77   : > { %5357 = vst [vmem:[#allocation14_spill] sm:$0xff] %v4085_v43 }
  0x79   : > { %750 = vmatmul.mubr.f32.gmra.mrb[40].mxu1 %v749_v6  ;;  %1760 = vmatmul.mubr.f32.gmra.mrb[42].mxu0 %v758_v22  ;;  %v771_v6 = vand.u32 4294901760, %v770_v57  ;;  %v781_v22 = vsub.f32 %v4063_v48, %v780_v21  ;;  %v802_v57 = vand.u32 4294901760, %v4085_v43  ;;  %v4096_v48 = vand.u32 4294901760, %v3919_v27 }
  0x7a   : > { %755 = vmatprep.mubr.f32.mxu1 %v3645_v0  ;;  %1765 = vmatprep.mubr.f32.mxu0 %v3645_v0 }
  0x7d   : > { %761 = vmatmul.mubr.f32.gmra.mrb[42].mxu1 %v760_v60  ;;  %1769 = vmatmul.mubr.f32.gmra.mrb[44].mxu0 %v769_v62  ;;  %v782_v62 = vand.u32 4294901760, %v781_v22  ;;  %v792_v60 = vsub.f32 %v4074_v12, %v791_v16  ;;  %v4107_v22 = vsub.f32 %v3919_v27, %v4096_v48  ;;  %v4113_v12 = vsub.f32 %v3922_v28, %v4101_v63 }
  0x7e   : > { %766 = vmatprep.mubr.f32.mxu1 %v3645_v0  ;;  %1774 = vmatprep.mubr.f32.mxu0 %v3645_v0 }
  0x7f   : > { %v793_v4 = vand.u32 4294901760, %v792_v60  ;;  %5359 = vst [vmem:[#allocation16_spill] sm:$0xff] %v4107_v22  ;;  %5360 = vst [vmem:[#allocation17_spill] sm:$0xff] %v4113_v12  ;;  %v824_v60 = vand.u32 4294901760, %v4107_v22  ;;  %v835_v27 = vand.u32 4294901760, %v4113_v12 }
  0x81   : > { %772 = vmatmul.mubr.f32.gmra.mrb[44].mxu1 %v771_v6  ;;  %1778 = vmatmul.mubr.f32.gmra.mrb[46].mxu0 %v780_v21  ;;  %v803_v21 = vsub.f32 %v4085_v43, %v802_v57  ;;  %v813_v6 = vand.u32 4294901760, %v4091_v55  ;;  %v4118_v43 = vand.u32 4294901760, %v3929_v36 }
  0x82   : > { %777 = vmatprep.mubr.f32.mxu1 %v3645_v0  ;;  %1783 = vmatprep.mubr.f32.mxu0 %v3645_v0 }
  0x85   : > { %783 = vmatmul.mubr.f32.gmra.mrb[46].mxu1 %v782_v62  ;;  %1787 = vmatmul.mubr.f32.gmra.mrb[48].mxu0 %v791_v16  ;;  %v804_v16 = vand.u32 4294901760, %v803_v21  ;;  %v814_v62 = vsub.f32 %v4091_v55, %v813_v6  ;;  %v4129_v21 = vand.u32 4294901760, %v3944_v56  ;;  %v836_v55 = vsub.f32 %v4113_v12, %v835_v27 }
  0x86   : > { %788 = vmatprep.mubr.f32.mxu1 %v3645_v0  ;;  %1792 = vmatprep.mubr.f32.mxu0 %v3645_v0 }
  0x87   : > { %v815_v28 = vand.u32 4294901760, %v814_v62  ;;  %v4137_v62 = vsub.f32 %v3944_v56, %v4129_v21 }
  0x89   : > { %794 = vmatmul.mubr.f32.gmra.mrb[48].mxu1 %v793_v4  ;;  %1796 = vmatmul.mubr.f32.gmra.mrb[50].mxu0 %v802_v57  ;;  %v825_v4 = vsub.f32 %v4107_v22, %v824_v60  ;;  %v4126_v57 = vsub.f32 %v3929_v36, %v4118_v43  ;;  %v4140_v36 = vand.u32 4294901760, %v3949_v61  ;;  %v837_v22 = vand.u32 4294901760, %v836_v55 }
  0x8a   : > { %799 = vmatprep.mubr.f32.mxu1 %v3645_v0  ;;  %1801 = vmatprep.mubr.f32.mxu0 %v3645_v0 }
  0x8d   : > { %805 = vmatmul.mubr.f32.gmra.mrb[50].mxu1 %v804_v16  ;;  %1805 = vmatmul.mubr.f32.gmra.mrb[52].mxu0 %v813_v6  ;;  %v826_v16 = vand.u32 4294901760, %v825_v4  ;;  %v846_v6 = vand.u32 4294901760, %v4126_v57  ;;  %v4148_v4 = vsub.f32 %v3949_v61, %v4140_v36 }
  0x8e   : > { %810 = vmatprep.mubr.f32.mxu1 %v3645_v0  ;;  %1810 = vmatprep.mubr.f32.mxu0 %v3645_v0 }
  0x91   : > { %816 = vmatmul.mubr.f32.gmra.mrb[52].mxu1 %v815_v28  ;;  %1814 = vmatmul.mubr.f32.gmra.mrb[54].mxu0 %v824_v60  ;;  %v847_v28 = vsub.f32 %v4126_v57, %v846_v6  ;;  %v857_v60 = vand.u32 4294901760, %v4137_v62 }
  0x92   : > { %821 = vmatprep.mubr.f32.mxu1 %v3645_v0  ;;  %1819 = vmatprep.mubr.f32.mxu0 %v3645_v0 }
  0x93   : > { %v848_v56 = vand.u32 4294901760, %v847_v28  ;;  %v858_v12 = vsub.f32 %v4137_v62, %v857_v60 }
  0x95   : > { %827 = vmatmul.mubr.f32.gmra.mrb[54].mxu1 %v826_v16  ;;  %1823 = vmatmul.mubr.f32.gmra.mrb[56].mxu0 %v835_v27  ;;  %v868_v27 = vand.u32 4294901760, %v4148_v4  ;;  %v859_v55 = vand.u32 4294901760, %v858_v12 }
  0x96   : > { %832 = vmatprep.mubr.f32.mxu1 %v3645_v0  ;;  %1828 = vmatprep.mubr.f32.mxu0 %v3645_v0 }
  0x97   : > { %v869_v61 = vsub.f32 %v4148_v4, %v868_v27 }
  0x99   : > { %838 = vmatmul.mubr.f32.gmra.mrb[56].mxu1 %v837_v22  ;;  %1832 = vmatmul.mubr.f32.gmra.mrb[58].mxu0 %v846_v6  ;;  %v870_v22 = vand.u32 4294901760, %v869_v61 }
  0x9a   : > { %843 = vmatprep.mubr.f32.mxu1 %v3645_v0  ;;  %1837 = vmatprep.mubr.f32.mxu0 %v3645_v0 }
  0x9d   : > { %849 = vmatmul.mubr.f32.gmra.mrb[58].mxu1 %v848_v56  ;;  %1841 = vmatmul.mubr.f32.gmra.mrb[60].mxu0 %v857_v60 }
  0x9e   : > { %854 = vmatprep.mubr.f32.mxu1 %v3645_v0  ;;  %1846 = vmatprep.mubr.f32.mxu0 %v3645_v0 }
  0xa1   : > { %860 = vmatmul.mubr.f32.gmra.mrb[60].mxu1 %v859_v55  ;;  %1850 = vmatmul.mubr.f32.gmra.mrb[62].mxu0 %v868_v27 }
  0xa2   : > { %865 = vmatprep.mubr.f32.mxu1 %v3645_v0  ;;  %1926 = vmatprep.mubr.f32.mxu0 %v3645_v0 }
  0xa5   : > { %871 = vmatmul.mubr.f32.gmra.mrb[62].mxu1 %v870_v22  ;;  %1928 = vmatmul.mubr.f32.vlgmr.msra.gmra.mrb[0].mxu0 %v3744_v10 }
  0xa6   : > { %951 = vmatprep.mubr.f32.mxu1 %v3645_v0  ;;  %1933 = vmatprep.mubr.f32.mxu0 %v3645_v0 }
  0xa7   : > { %2154 = vmatpush1.msra.mxu0 %v3738_v5  ;;  %v5361_v5 = vld [vmem:[#allocation5_spill] sm:$0xff] }
  0xa9   : > { %953 = vmatmul.mubr.f32.vlgmr.msra.gmra.mrb[0].mxu1 %v3744_v10  ;;  %1935 = vmatmul.mubr.f32.gmra.mrb[2].mxu0 %v3753_v17 }
  0xaa   : > { %1181 = vmatpush1.msra.mxu1 %v3751_v15  ;;  %958 = vmatprep.mubr.f32.mxu1 %v3645_v0  ;;  %v5363_v15 = vld [vmem:[#allocation7_spill] sm:$0xff] }
  0xab   : > { %1940 = vmatprep.mubr.f32.mxu0 %v3645_v0 }
  0xad   : > { %960 = vmatmul.mubr.f32.gmra.mrb[2].mxu1 %v3753_v17  ;;  %1942 = vmatmul.mubr.f32.gmra.mrb[4].mxu0 %v3755_v18 }
  0xae   : > { %965 = vmatprep.mubr.f32.mxu1 %v3645_v0  ;;  %1947 = vmatprep.mubr.f32.mxu0 %v3645_v0 }
  0xb1   : > { %967 = vmatmul.mubr.f32.gmra.mrb[4].mxu1 %v3755_v18  ;;  %1949 = vmatmul.mubr.f32.gmra.mrb[6].mxu0 %v3762_v20 }
  0xb2   : > { %972 = vmatprep.mubr.f32.mxu1 %v3645_v0  ;;  %1954 = vmatprep.mubr.f32.mxu0 %v3645_v0 }
  0xb5   : > { %974 = vmatmul.mubr.f32.gmra.mrb[6].mxu1 %v3762_v20  ;;  %1956 = vmatmul.mubr.f32.gmra.mrb[8].mxu0 %v3776_v31 }
  0xb6   : > { %979 = vmatprep.mubr.f32.mxu1 %v3645_v0  ;;  %1961 = vmatprep.mubr.f32.mxu0 %v3645_v0 }
  0xb9   : > { %981 = vmatmul.mubr.f32.gmra.mrb[8].mxu1 %v3776_v31  ;;  %1963 = vmatmul.mubr.f32.gmra.mrb[10].mxu0 %v3790_v42 }
  0xba   : > { %986 = vmatprep.mubr.f32.mxu1 %v3645_v0  ;;  %1968 = vmatprep.mubr.f32.mxu0 %v3645_v0 }
  0xbd   : > { %988 = vmatmul.mubr.f32.gmra.mrb[10].mxu1 %v3790_v42  ;;  %1970 = vmatmul.mubr.f32.gmra.mrb[12].mxu0 %v3803_v52 }
  0xbe   : > { %993 = vmatprep.mubr.f32.mxu1 %v3645_v0  ;;  %1975 = vmatprep.mubr.f32.mxu0 %v3645_v0 }
  0xc1   : > { %995 = vmatmul.mubr.f32.gmra.mrb[12].mxu1 %v3803_v52  ;;  %1977 = vmatmul.mubr.f32.gmra.mrb[14].mxu0 %v3814_v59 }
  0xc2   : > { %1000 = vmatprep.mubr.f32.mxu1 %v3645_v0  ;;  %1982 = vmatprep.mubr.f32.mxu0 %v3645_v0 }
  0xc5   : > { %1002 = vmatmul.mubr.f32.gmra.mrb[14].mxu1 %v3814_v59  ;;  %1984 = vmatmul.mubr.f32.gmra.mrb[16].mxu0 %v3830_v9 }
  0xc6   : > { %1007 = vmatprep.mubr.f32.mxu1 %v3645_v0  ;;  %1989 = vmatprep.mubr.f32.mxu0 %v3645_v0 }
  0xc9   : > { %1009 = vmatmul.mubr.f32.gmra.mrb[16].mxu1 %v3830_v9  ;;  %1991 = vmatmul.mubr.f32.gmra.mrb[18].mxu0 %v3848_v23 }
  0xca   : > { %1014 = vmatprep.mubr.f32.mxu1 %v3645_v0  ;;  %1996 = vmatprep.mubr.f32.mxu0 %v3645_v0 }
  0xcd   : > { %1016 = vmatmul.mubr.f32.gmra.mrb[18].mxu1 %v3848_v23  ;;  %1998 = vmatmul.mubr.f32.gmra.mrb[20].mxu0 %v3867_v37 }
  0xce   : > { %1021 = vmatprep.mubr.f32.mxu1 %v3645_v0  ;;  %2003 = vmatprep.mubr.f32.mxu0 %v3645_v0 }
  0xd1   : > { %1023 = vmatmul.mubr.f32.gmra.mrb[20].mxu1 %v3867_v37  ;;  %2005 = vmatmul.mubr.f32.gmra.mrb[22].mxu0 %v3887_v53 }
  0xd2   : > { %1028 = vmatprep.mubr.f32.mxu1 %v3645_v0  ;;  %2010 = vmatprep.mubr.f32.mxu0 %v3645_v0 }
  0xd5   : > { %1030 = vmatmul.mubr.f32.gmra.mrb[22].mxu1 %v3887_v53  ;;  %2012 = vmatmul.mubr.f32.gmra.mrb[24].mxu0 %v3914_v11 }
  0xd6   : > { %1035 = vmatprep.mubr.f32.mxu1 %v3645_v0  ;;  %2017 = vmatprep.mubr.f32.mxu0 %v3645_v0 }
  0xd9   : > { %1037 = vmatmul.mubr.f32.gmra.mrb[24].mxu1 %v3914_v11  ;;  %2019 = vmatmul.mubr.f32.gmra.mrb[26].mxu0 %v3937_v46 }
  0xda   : > { %1042 = vmatprep.mubr.f32.mxu1 %v3645_v0  ;;  %2024 = vmatprep.mubr.f32.mxu0 %v3645_v0 }
  0xdd   : > { %1044 = vmatmul.mubr.f32.gmra.mrb[26].mxu1 %v3937_v46  ;;  %2026 = vmatmul.mubr.f32.gmra.mrb[28].mxu0 %v3955_v3 }
  0xde   : > { %1049 = vmatprep.mubr.f32.mxu1 %v3645_v0  ;;  %2031 = vmatprep.mubr.f32.mxu0 %v3645_v0 }
  0xe1   : > { %1051 = vmatmul.mubr.f32.gmra.mrb[28].mxu1 %v3955_v3  ;;  %2033 = vmatmul.mubr.f32.gmra.mrb[30].mxu0 %v3965_v29 }
  0xe2   : > { %1056 = vmatprep.mubr.f32.mxu1 %v3645_v0  ;;  %2038 = vmatprep.mubr.f32.mxu0 %v3645_v0 }
  0xe5   : > { %1058 = vmatmul.mubr.f32.gmra.mrb[30].mxu1 %v3965_v29  ;;  %2040 = vmatmul.mubr.f32.gmra.mrb[32].mxu0 %v3970_v38 }
  0xe6   : > { %1063 = vmatprep.mubr.f32.mxu1 %v3645_v0  ;;  %2045 = vmatprep.mubr.f32.mxu0 %v3645_v0 }
  0xe9   : > { %1065 = vmatmul.mubr.f32.gmra.mrb[32].mxu1 %v3970_v38  ;;  %2047 = vmatmul.mubr.f32.gmra.mrb[34].mxu0 %v3986_v1 }
  0xea   : > { %1070 = vmatprep.mubr.f32.mxu1 %v3645_v0  ;;  %2052 = vmatprep.mubr.f32.mxu0 %v3645_v0 }
  0xed   : > { %1072 = vmatmul.mubr.f32.gmra.mrb[34].mxu1 %v3986_v1  ;;  %2054 = vmatmul.mubr.f32.gmra.mrb[36].mxu0 %v3991_v13 }
  0xee   : > { %1077 = vmatprep.mubr.f32.mxu1 %v3645_v0  ;;  %2059 = vmatprep.mubr.f32.mxu0 %v3645_v0 }
  0xf1   : > { %1079 = vmatmul.mubr.f32.gmra.mrb[36].mxu1 %v3991_v13  ;;  %2061 = vmatmul.mubr.f32.gmra.mrb[38].mxu0 %v4002_v40 }
  0xf2   : > { %1084 = vmatprep.mubr.f32.mxu1 %v3645_v0  ;;  %2066 = vmatprep.mubr.f32.mxu0 %v3645_v0 }
  0xf5   : > { %1086 = vmatmul.mubr.f32.gmra.mrb[38].mxu1 %v4002_v40  ;;  %2068 = vmatmul.mubr.f32.gmra.mrb[40].mxu0 %v4019_v50 }
  0xf6   : > { %1091 = vmatprep.mubr.f32.mxu1 %v3645_v0  ;;  %2073 = vmatprep.mubr.f32.mxu0 %v3645_v0 }
  0xf9   : > { %1093 = vmatmul.mubr.f32.gmra.mrb[40].mxu1 %v4019_v50  ;;  %2075 = vmatmul.mubr.f32.gmra.mrb[42].mxu0 %v4030_v45 }
  0xfa   : > { %1098 = vmatprep.mubr.f32.mxu1 %v3645_v0  ;;  %2080 = vmatprep.mubr.f32.mxu0 %v3645_v0 }
  0xfd   : > { %1100 = vmatmul.mubr.f32.gmra.mrb[42].mxu1 %v4030_v45  ;;  %2082 = vmatmul.mubr.f32.gmra.mrb[44].mxu0 %v4041_v33 }
  0xfe   : > { %1105 = vmatprep.mubr.f32.mxu1 %v3645_v0  ;;  %2087 = vmatprep.mubr.f32.mxu0 %v3645_v0 }
 0x101   : > { %1107 = vmatmul.mubr.f32.gmra.mrb[44].mxu1 %v4041_v33  ;;  %2089 = vmatmul.mubr.f32.gmra.mrb[46].mxu0 %v4052_v35 }
 0x102   : > { %1112 = vmatprep.mubr.f32.mxu1 %v3645_v0  ;;  %2094 = vmatprep.mubr.f32.mxu0 %v3645_v0 }
 0x105   : > { %1114 = vmatmul.mubr.f32.gmra.mrb[46].mxu1 %v4052_v35  ;;  %2096 = vmatmul.mubr.f32.gmra.mrb[48].mxu0 %v4057_v14 }
 0x106   : > { %1119 = vmatprep.mubr.f32.mxu1 %v3645_v0  ;;  %2101 = vmatprep.mubr.f32.mxu0 %v3645_v0 }
 0x109   : > { %1121 = vmatmul.mubr.f32.gmra.mrb[48].mxu1 %v4057_v14  ;;  %2103 = vmatmul.mubr.f32.gmra.mrb[50].mxu0 %v4068_v26 }
 0x10a   : > { %1126 = vmatprep.mubr.f32.mxu1 %v3645_v0  ;;  %2108 = vmatprep.mubr.f32.mxu0 %v3645_v0 }
 0x10d   : > { %1128 = vmatmul.mubr.f32.gmra.mrb[50].mxu1 %v4068_v26  ;;  %2110 = vmatmul.mubr.f32.gmra.mrb[52].mxu0 %v4079_v54 }
 0x10e   : > { %1133 = vmatprep.mubr.f32.mxu1 %v3645_v0  ;;  %2115 = vmatprep.mubr.f32.mxu0 %v3645_v0 }
 0x111   : > { %1135 = vmatmul.mubr.f32.gmra.mrb[52].mxu1 %v4079_v54  ;;  %2117 = vmatmul.mubr.f32.gmra.mrb[54].mxu0 %v4096_v48 }
 0x112   : > { %1140 = vmatprep.mubr.f32.mxu1 %v3645_v0  ;;  %2122 = vmatprep.mubr.f32.mxu0 %v3645_v0 }
 0x115   : > { %1142 = vmatmul.mubr.f32.gmra.mrb[54].mxu1 %v4096_v48  ;;  %2124 = vmatmul.mubr.f32.gmra.mrb[56].mxu0 %v4101_v63 }
 0x116   : > { %1147 = vmatprep.mubr.f32.mxu1 %v3645_v0  ;;  %2129 = vmatprep.mubr.f32.mxu0 %v3645_v0 }
 0x119   : > { %1149 = vmatmul.mubr.f32.gmra.mrb[56].mxu1 %v4101_v63  ;;  %2131 = vmatmul.mubr.f32.gmra.mrb[58].mxu0 %v4118_v43 }
 0x11a   : > { %1154 = vmatprep.mubr.f32.mxu1 %v3645_v0  ;;  %2136 = vmatprep.mubr.f32.mxu0 %v3645_v0 }
 0x11d   : > { %1156 = vmatmul.mubr.f32.gmra.mrb[58].mxu1 %v4118_v43  ;;  %2138 = vmatmul.mubr.f32.gmra.mrb[60].mxu0 %v4129_v21 }
 0x11e   : > { %1161 = vmatprep.mubr.f32.mxu1 %v3645_v0  ;;  %2143 = vmatprep.mubr.f32.mxu0 %v3645_v0 }
 0x121   : > { %1163 = vmatmul.mubr.f32.gmra.mrb[60].mxu1 %v4129_v21  ;;  %2145 = vmatmul.mubr.f32.gmra.mrb[62].mxu0 %v4140_v36 }
 0x122   : > { %1168 = vmatprep.mubr.f32.mxu1 %v3645_v0  ;;  %2217 = vmatprep.mubr.f32.mxu0 %v3645_v0 }
 0x125   : > { %1170 = vmatmul.mubr.f32.gmra.mrb[62].mxu1 %v4140_v36  ;;  %2219 = vmatmul.mubr.f32.vlgmr.msra.gmra.mrb[0].mxu0 %v3744_v10  ;;  %v5362_v10 = vld [vmem:[#allocation6_spill] sm:$0xff] }
 0x126   : > { %1244 = vmatprep.mubr.f32.mxu1 %v3645_v0  ;;  %2224 = vmatprep.mubr.f32.mxu0 %v3645_v0 }
 0x129   : > { %1247 = vmatmul.mubr.f32.vlgmr.msra.gmra.mrb[0].mxu1 %v3759_v19  ;;  %2226 = vmatmul.mubr.f32.gmra.mrb[2].mxu0 %v3753_v17  ;;  %v5364_v17 = vld [vmem:[#allocation8_spill] sm:$0xff]  ;;  %v5366_v19 = vld [vmem:[#allocation10_spill] sm:$0xff] }
 0x12a   : > { %1252 = vmatprep.mubr.f32.mxu1 %v3645_v0  ;;  %2231 = vmatprep.mubr.f32.mxu0 %v3645_v0 }
 0x12d   : > { %1255 = vmatmul.mubr.f32.gmra.mrb[2].mxu1 %v3767_v24  ;;  %2233 = vmatmul.mubr.f32.gmra.mrb[4].mxu0 %v3755_v18  ;;  %v5365_v18 = vld [vmem:[#allocation9_spill] sm:$0xff]  ;;  %v5368_v24 = vld [vmem:[#allocation12_spill] sm:$0xff] }
 0x12e   : > { %1260 = vmatprep.mubr.f32.mxu1 %v3645_v0  ;;  %2238 = vmatprep.mubr.f32.mxu0 %v3645_v0 }
 0x131   : > { %1263 = vmatmul.mubr.f32.gmra.mrb[4].mxu1 %v3770_v25  ;;  %2240 = vmatmul.mubr.f32.gmra.mrb[6].mxu0 %v3762_v20  ;;  %v5367_v20 = vld [vmem:[#allocation11_spill] sm:$0xff]  ;;  %v5369_v25 = vld [vmem:[#allocation13_spill] sm:$0xff] }
 0x132   : > { %1268 = vmatprep.mubr.f32.mxu1 %v3645_v0  ;;  %2245 = vmatprep.mubr.f32.mxu0 %v3645_v0 }
 0x135   : > { %1271 = vmatmul.mubr.f32.gmra.mrb[6].mxu1 %v3781_v34  ;;  %2247 = vmatmul.mubr.f32.gmra.mrb[8].mxu0 %v3776_v31  ;;  %v5370_v31 = vld [vmem:[#allocation14_spill] sm:$0xff]  ;;  %v5371_v34 = vld [vmem:[#allocation15_spill] sm:$0xff] }
 0x136   : > { %1276 = vmatprep.mubr.f32.mxu1 %v3645_v0  ;;  %2252 = vmatprep.mubr.f32.mxu0 %v3645_v0 }
 0x139   : > { %1279 = vmatmul.mubr.f32.gmra.mrb[8].mxu1 %v3788_v41  ;;  %2254 = vmatmul.mubr.f32.gmra.mrb[10].mxu0 %v3790_v42  ;;  %v5372_v41 = vld [vmem:[#allocation16_spill] sm:$0xff]  ;;  %v5373_v42 = vld [vmem:[#allocation17_spill] sm:$0xff] }
 0x13a   : > { %1284 = vmatprep.mubr.f32.mxu1 %v3645_v0  ;;  %2259 = vmatprep.mubr.f32.mxu0 %v3645_v0 }
 0x13d   : > { %1287 = vmatmul.mubr.f32.gmra.mrb[10].mxu1 %v3800_v49  ;;  %2261 = vmatmul.mubr.f32.gmra.mrb[12].mxu0 %v3803_v52  ;;  %v295_v49 = vld [vmem:[%s5331_s2] sm:$0xff]  ;;  %v296_v52 = vld [vmem:[%s5331_s2 + $0x8] sm:$0xff] }
 0x13e   : > { %1292 = vmatprep.mubr.f32.mxu1 %v3645_v0  ;;  %2266 = vmatprep.mubr.f32.mxu0 %v3645_v0  ;;  %vm311_vm1 = vnez %v295_v49  ;;  %vm312_vm2 = vnez %v296_v52 }
 0x141   : > { %1295 = vmatmul.mubr.f32.gmra.mrb[12].mxu1 %v3812_v58  ;;  %2268 = vmatmul.mubr.f32.gmra.mrb[14].mxu0 %v3814_v59  ;;  %v3646_v58 = vmov 0  }
 0x142   : > { %1300 = vmatprep.mubr.f32.mxu1 %v3645_v0  ;;  %2273 = vmatprep.mubr.f32.mxu0 %v3645_v0  ;;  %v2506_v59 = vsel %vm311_vm1, 16843009, %v3646_v58 }
 0x145   : > { %1303 = vmatmul.mubr.f32.gmra.mrb[14].mxu1 %v3828_v8  ;;  %2275 = vmatmul.mubr.f32.gmra.mrb[16].mxu0 %v3830_v9  ;;  %v2507_v8 = vsel %vm312_vm2, 16843009, %v3646_v58  ;;  %v2522_v9 = vunpack.c.0.s8 %v2506_v59 }
 0x146   : > { %1308 = vmatprep.mubr.f32.mxu1 %v3645_v0  ;;  %2280 = vmatprep.mubr.f32.mxu0 %v3645_v0 }
 0x149   : > { %1311 = vmatmul.mubr.f32.gmra.mrb[16].mxu1 %v3855_v30  ;;  %2282 = vmatmul.mubr.f32.gmra.mrb[18].mxu0 %v3848_v23  ;;  %v2523_v23 = vunpack.c.0.s8 %v2507_v8  ;;  %v298_v30 = vld [vmem:[%s5331_s2 + $0x18] sm:$0xff] }
 0x14a   : > { %1316 = vmatprep.mubr.f32.mxu1 %v3645_v0  ;;  %2287 = vmatprep.mubr.f32.mxu0 %v3645_v0  ;;  %vm314_vm4 = vnez %v298_v30 }
 0x14d   : > { %1319 = vmatmul.mubr.f32.gmra.mrb[18].mxu1 %v3873_v44  ;;  %2289 = vmatmul.mubr.f32.gmra.mrb[20].mxu0 %v3867_v37  ;;  %v2586_v37 = vpack.c.b16 %v2523_v23, %v2522_v9  ;;  %v2524_v44 = vunpack.c.1.s8 %v2506_v59 }
 0x14e   : > { %1324 = vmatprep.mubr.f32.mxu1 %v3645_v0  ;;  %2294 = vmatprep.mubr.f32.mxu0 %v3645_v0 }
 0x151   : > { %1327 = vmatmul.mubr.f32.gmra.mrb[20].mxu1 %v3885_v51  ;;  %2296 = vmatmul.mubr.f32.gmra.mrb[22].mxu0 %v3887_v53  ;;  %v2525_v51 = vunpack.c.1.s8 %v2507_v8  ;;  %v2526_v53 = vunpack.c.2.s8 %v2506_v59 }
 0x152   : > { %1332 = vmatprep.mubr.f32.mxu1 %v3645_v0  ;;  %2301 = vmatprep.mubr.f32.mxu0 %v3645_v0 }
 0x155   : > { %1335 = vmatmul.mubr.f32.gmra.mrb[22].mxu1 %v3912_v7  ;;  %2303 = vmatmul.mubr.f32.gmra.mrb[24].mxu0 %v3914_v11  ;;  %v2527_v7 = vunpack.c.2.s8 %v2507_v8  ;;  %v2528_v11 = vunpack.c.3.s8 %v2506_v59 }
 0x156   : > { %1340 = vmatprep.mubr.f32.mxu1 %v3645_v0  ;;  %2308 = vmatprep.mubr.f32.mxu0 %v3645_v0 }
 0x159   : > { %1343 = vmatmul.mubr.f32.gmra.mrb[24].mxu1 %v3933_v39  ;;  %2310 = vmatmul.mubr.f32.gmra.mrb[26].mxu0 %v3937_v46  ;;  %v2529_v39 = vunpack.c.3.s8 %v2507_v8  ;;  %v299_v46 = vld [vmem:[%s5331_s2 + $0x20] sm:$0xff] }
 0x15a   : > { %1348 = vmatprep.mubr.f32.mxu1 %v3645_v0  ;;  %2315 = vmatprep.mubr.f32.mxu0 %v3645_v0  ;;  %vm315_vm5 = vnez %v299_v46 }
 0x15d   : > { %1351 = vmatmul.mubr.f32.gmra.mrb[26].mxu1 %v3953_v2  ;;  %2317 = vmatmul.mubr.f32.gmra.mrb[28].mxu0 %v3955_v3  ;;  %v300_v2 = vld [vmem:[%s5331_s2 + $0x28] sm:$0xff] }
 0x15e   : > { %1356 = vmatprep.mubr.f32.mxu1 %v3645_v0  ;;  %2322 = vmatprep.mubr.f32.mxu0 %v3645_v0  ;;  %vm316_vm6 = vnez %v300_v2 }
 0x161   : > { %1359 = vmatmul.mubr.f32.gmra.mrb[28].mxu1 %v3963_v32  ;;  %2324 = vmatmul.mubr.f32.gmra.mrb[30].mxu0 %v3965_v29  ;;  %v2509_v32 = vsel %vm314_vm4, 16843009, %v3646_v58  ;;  %v2587_v29 = vpack.c.b8 %v2586_v37, %v2586_v37 }
 0x162   : > { %1364 = vmatprep.mubr.f32.mxu1 %v3645_v0  ;;  %2329 = vmatprep.mubr.f32.mxu0 %v3645_v0 }
 0x163   : > { %vm2650_vm7 = vnez %v2587_v29 }
 0x165   : > { %1367 = vmatmul.mubr.f32.gmra.mrb[30].mxu1 %v3975_v47  ;;  %2331 = vmatmul.mubr.f32.gmra.mrb[32].mxu0 %v3970_v38  ;;  %v2588_v38 = vpack.c.b16 %v2525_v51, %v2524_v44  ;;  %v2590_v47 = vpack.c.b16 %v2527_v7, %v2526_v53 }
 0x166   : > { %1372 = vmatprep.mubr.f32.mxu1 %v3645_v0  ;;  %2336 = vmatprep.mubr.f32.mxu0 %v3645_v0 }
 0x167   : > { %v2589_v12 = vpack.c.b8 %v2588_v38, %v2588_v38 }
 0x169   : > { %1375 = vmatmul.mubr.f32.gmra.mrb[32].mxu1 %v5361_v5  ;;  %2338 = vmatmul.mubr.f32.gmra.mrb[34].mxu0 %v3986_v1  ;;  %vm2651_vm9 = vnez %v2589_v12 }
 0x16a   : > { %1380 = vmatprep.mubr.f32.mxu1 %v3645_v0  ;;  %2343 = vmatprep.mubr.f32.mxu0 %v3645_v0  ;;  %v2683_v5 = vsel %vm2651_vm9, 16843009, %v3646_v58 }
 0x16b   : > { %v2717_v52 = vunpack.c.1.s8 %v2683_v5 }
 0x16d   : > { %1383 = vmatmul.mubr.f32.gmra.mrb[34].mxu1 %v5362_v10  ;;  %2345 = vmatmul.mubr.f32.gmra.mrb[36].mxu0 %v3991_v13  ;;  %v2531_v13 = vunpack.c.0.s8 %v2509_v32 }
 0x16e   : > { %1388 = vmatprep.mubr.f32.mxu1 %v3645_v0  ;;  %2350 = vmatprep.mubr.f32.mxu0 %v3645_v0 }
 0x171   : > { %1391 = vmatmul.mubr.f32.gmra.mrb[36].mxu1 %v5363_v15  ;;  %2352 = vmatmul.mubr.f32.gmra.mrb[38].mxu0 %v4002_v40 }
 0x172   : > { %1396 = vmatprep.mubr.f32.mxu1 %v3645_v0  ;;  %2357 = vmatprep.mubr.f32.mxu0 %v3645_v0 }
 0x175   : > { %1399 = vmatmul.mubr.f32.gmra.mrb[38].mxu1 %v5364_v17  ;;  %2359 = vmatmul.mubr.f32.gmra.mrb[40].mxu0 %v4019_v50  ;;  %v2592_v50 = vpack.c.b16 %v2529_v39, %v2528_v11 }
 0x176   : > { %1404 = vmatprep.mubr.f32.mxu1 %v3645_v0  ;;  %2364 = vmatprep.mubr.f32.mxu0 %v3645_v0 }
 0x179   : > { %1407 = vmatmul.mubr.f32.gmra.mrb[40].mxu1 %v5365_v18  ;;  %2366 = vmatmul.mubr.f32.gmra.mrb[42].mxu0 %v4030_v45  ;;  %v4444_v45 = vsel %vm316_vm6, 16843009, %v3646_v58 }
 0x17a   : > { %1412 = vmatprep.mubr.f32.mxu1 %v3645_v0  ;;  %2371 = vmatprep.mubr.f32.mxu0 %v3645_v0  ;;  %v2539_v6 = vunpack.c.0.s8 %v4444_v45  ;;  %v2543_v2 = vunpack.c.2.s8 %v4444_v45 }
 0x17d   : > { %1415 = vmatmul.mubr.f32.gmra.mrb[42].mxu1 %v5366_v19  ;;  %2373 = vmatmul.mubr.f32.gmra.mrb[44].mxu0 %v4041_v33  ;;  %v2591_v33 = vpack.c.b8 %v2590_v47, %v2590_v47 }
 0x17e   : > { %1420 = vmatprep.mubr.f32.mxu1 %v3645_v0  ;;  %2378 = vmatprep.mubr.f32.mxu0 %v3645_v0 }
 0x17f   : > { %vm2652_vm8 = vnez %v2591_v33  ;;  %v2545_v33 = vunpack.c.3.s8 %v4444_v45 }
 0x180   : > { %v2684_v55 = vsel %vm2652_vm8, 16843009, %v3646_v58 }
 0x181   : > { %1423 = vmatmul.mubr.f32.gmra.mrb[44].mxu1 %v5367_v20  ;;  %2380 = vmatmul.mubr.f32.gmra.mrb[46].mxu0 %v4052_v35  ;;  %v2535_v35 = vunpack.c.2.s8 %v2509_v32  ;;  %v2541_v20 = vunpack.c.1.s8 %v4444_v45 }
 0x182   : > { %1428 = vmatprep.mubr.f32.mxu1 %v3645_v0  ;;  %2385 = vmatprep.mubr.f32.mxu0 %v3645_v0 }
 0x185   : > { %1431 = vmatmul.mubr.f32.gmra.mrb[46].mxu1 %v5368_v24  ;;  %2387 = vmatmul.mubr.f32.gmra.mrb[48].mxu0 %v4057_v14  ;;  %v2533_v14 = vunpack.c.1.s8 %v2509_v32  ;;  %v2718_v24 = vunpack.c.0.s8 %v2684_v55 }
 0x186   : > { %1436 = vmatprep.mubr.f32.mxu1 %v3645_v0  ;;  %2392 = vmatprep.mubr.f32.mxu0 %v3645_v0 }
 0x187   : > { %vm4480_vm1 = vcmp.ne.s32.totalorder %v2718_v24, 0 }
 0x189   : > { %1439 = vmatmul.mubr.f32.gmra.mrb[48].mxu1 %v5369_v25  ;;  %2394 = vmatmul.mubr.f32.gmra.mrb[50].mxu0 %v4068_v26  ;;  %v4441_v26 = vsel %vm315_vm5, 16843009, %v3646_v58 }
 0x18a   : > { %1444 = vmatprep.mubr.f32.mxu1 %v3645_v0  ;;  %2399 = vmatprep.mubr.f32.mxu0 %v3645_v0  ;;  %v2538_v16 = vunpack.c.0.s8 %v4441_v26  ;;  %v2540_v19 = vunpack.c.1.s8 %v4441_v26  ;;  %v2542_v46 = vunpack.c.2.s8 %v4441_v26  ;;  %v2544_v12 = vunpack.c.3.s8 %v4441_v26 }
 0x18b   : > { %v290_v26 = vlaneseq }
 0x18c   : > { %v2602_v56 = vpack.c.b16 %v2539_v6, %v2538_v16  ;;  %v2604_v53 = vpack.c.b16 %v2541_v20, %v2540_v19 }
 0x18d   : > { %1447 = vmatmul.mubr.f32.gmra.mrb[50].mxu1 %v5370_v31  ;;  %2401 = vmatmul.mubr.f32.gmra.mrb[52].mxu0 %v4079_v54  ;;  %v2716_v31 = vunpack.c.0.s8 %v2683_v5  ;;  %v2608_v5 = vpack.c.b16 %v2545_v33, %v2544_v12 }
 0x18e   : > { %1452 = vmatprep.mubr.f32.mxu1 %v3645_v0  ;;  %2406 = vmatprep.mubr.f32.mxu0 %v3645_v0  ;;  %v2603_v25 = vpack.c.b8 %v2602_v56, %v2602_v56  ;;  %v2605_v6 = vpack.c.b8 %v2604_v53, %v2604_v53 }
 0x18f   : > { %vm4524_vm4 = vcmp.ne.s32.totalorder %v2716_v31, 0 }
 0x190   : > { %vm4484_vm2 = vnez %v2603_v25 }
 0x191   : > { %1455 = vmatmul.mubr.f32.gmra.mrb[52].mxu1 %v5371_v34  ;;  %2408 = vmatmul.mubr.f32.gmra.mrb[54].mxu0 %v4096_v48  ;;  %v2593_v48 = vpack.c.b8 %v2592_v50, %v2592_v50  ;;  %v2719_v34 = vunpack.c.1.s8 %v2684_v55  ;;  %v301_v50 = vld [vmem:[%s5331_s2 + $0x30] sm:$0xff] }
 0x192   : > { %1460 = vmatprep.mubr.f32.mxu1 %v3645_v0  ;;  %2413 = vmatprep.mubr.f32.mxu0 %v3645_v0  ;;  %vm317_vm6 = vnez %v301_v50 }
 0x193   : > { %vm2653_vm10 = vnez %v2593_v48  ;;  %v4562_v24 = vsel %vm317_vm6, 16843009, %v3646_v58 }
 0x194   : > { %v2685_v10 = vsel %vm2653_vm10, 16843009, %v3646_v58  ;;  %vm4546_vm10 = vcmp.lt.s32.totalorder %v290_v26, 256  ;;  %v2550_v9 = vunpack.c.2.s8 %v4562_v24  ;;  %v2552_v33 = vunpack.c.3.s8 %v4562_v24 }
 0x195   : > { %1463 = vmatmul.mubr.f32.gmra.mrb[54].mxu1 %v5372_v41  ;;  %2415 = vmatmul.mubr.f32.gmra.mrb[56].mxu0 %v4101_v63  ;;  %v2720_v59 = vunpack.c.0.s8 %v2685_v10 }
 0x196   : > { %1468 = vmatprep.mubr.f32.mxu1 %v3645_v0  ;;  %2420 = vmatprep.mubr.f32.mxu0 %v3645_v0 }
 0x197   : > { %vm4530_vm5 = vcmp.ne.s32.totalorder %v2720_v59, 0 }
 0x199   : > { %1471 = vmatmul.mubr.f32.gmra.mrb[56].mxu1 %v5373_v42  ;;  %2422 = vmatmul.mubr.f32.gmra.mrb[58].mxu0 %v4118_v43  ;;  %v2546_v42 = vunpack.c.0.s8 %v4562_v24 }
 0x19a   : > { %1476 = vmatprep.mubr.f32.mxu1 %v3645_v0  ;;  %2427 = vmatprep.mubr.f32.mxu0 %v3645_v0 }
 0x19d   : > { %1479 = vmatmul.mubr.f32.gmra.mrb[58].mxu1 %v4126_v57  ;;  %2429 = vmatmul.mubr.f32.gmra.mrb[60].mxu0 %v4129_v21  ;;  %v2537_v57 = vunpack.c.3.s8 %v2509_v32  ;;  %v2721_v32 = vunpack.c.1.s8 %v2685_v10  ;;  %v3647_v10 = vmov 1e+30  }
 0x19e   : > { %1484 = vmatprep.mubr.f32.mxu1 %v3645_v0  ;;  %2434 = vmatprep.mubr.f32.mxu0 %v3645_v0  ;;  %294 = vst.msk [vmem:[%s4553_s9] sm:$0x3] %vm4546_vm10, %v3647_v10 }
 0x19f   : > { %vm4541_vm8 = vcmp.ne.s32.totalorder %v2721_v32, 0 }
 0x1a1   : > { %1487 = vmatmul.mubr.f32.gmra.mrb[60].mxu1 %v4137_v62  ;;  %2436 = vmatmul.mubr.f32.gmra.mrb[62].mxu0 %v4140_v36  ;;  %v2682_v62 = vsel %vm2650_vm7, 16843009, %v3646_v58  ;;  %vm4537_vm7 = vcmp.ne.s32.totalorder %v2717_v52, 0 }
 0x1a2   : > { %1492 = vmatprep.mubr.f32.mxu1 %v3645_v0  ;;  %v297_v0 = vld [vmem:[%s5331_s2 + $0x10] sm:$0xff]  ;;  %v2714_v27 = vunpack.c.0.s8 %v2682_v62  ;;  %v2715_v22 = vunpack.c.1.s8 %v2682_v62  ;;  %v2606_v62 = vpack.c.b16 %v2543_v2, %v2542_v46 }
 0x1a3   : > { %vm313_vm3 = vnez %v297_v0 }
 0x1a4   : > { %v2508_v3 = vsel %vm313_vm3, 16843009, %v3646_v58  ;;  %vm4454_vm13 = vcmp.ne.s32.totalorder %v2714_v27, 0  ;;  %vm4467_vm15 = vcmp.ne.s32.totalorder %v2715_v22, 0  ;;  %vm4490_vm3 = vcmp.ne.s32.totalorder %v2719_v34, 0 }
 0x1a5   : > { %1495 = vmatmul.mubr.f32.gmra.mrb[62].mxu1 %v4148_v4  ;;  %v2530_v1 = vunpack.c.0.s8 %v2508_v3  ;;  %v2532_v40 = vunpack.c.1.s8 %v2508_v3  ;;  %v2534_v43 = vunpack.c.2.s8 %v2508_v3  ;;  %v2536_v63 = vunpack.c.3.s8 %v2508_v3 }
 0x1a7   : > { %v2594_v54 = vpack.c.b16 %v2531_v13, %v2530_v1  ;;  %v2596_v21 = vpack.c.b16 %v2533_v14, %v2532_v40  ;;  %v2598_v36 = vpack.c.b16 %v2535_v35, %v2534_v43  ;;  %v2600_v60 = vpack.c.b16 %v2537_v57, %v2536_v63  ;;  %v302_v43 = vld [vmem:[%s5331_s2 + $0x38] sm:$0xff] }
 0x1a8   : > { %v4521_v57 = vsel %vm4484_vm2, 16843009, %v3646_v58  ;;  %vm318_vm9 = vnez %v302_v43 }
 0x1a9   : > { %v2595_v28 = vpack.c.b8 %v2594_v54, %v2594_v54  ;;  %v2597_v4 = vpack.c.b8 %v2596_v21, %v2596_v21  ;;  %v2599_v15 = vpack.c.b8 %v2598_v36, %v2598_v36  ;;  %v2601_v18 = vpack.c.b8 %v2600_v60, %v2600_v60 }
 0x1aa   : > { %v2730_v34 = vunpack.c.0.s8 %v4521_v57 }
 0x1ab   : > { %vm2654_vm11 = vnez %v2595_v28  ;;  %vm2655_vm12 = vnez %v2597_v4  ;;  %vm4461_vm14 = vnez %v2599_v15  ;;  %vm4474_vm0 = vnez %v2601_v18 }
 0x1ac   : > { %v4459_v8 = vsel %vm2654_vm11, 16843009, %v3646_v58  ;;  %v4472_v44 = vsel %vm2655_vm12, 16843009, %v3646_v58  ;;  %v4499_v47 = vsel %vm4461_vm14, 16843009, %v3646_v58  ;;  %vm4580_vm14 = vnez %v2605_v6 }
 0x1ad   : > { %v2722_v29 = vunpack.c.0.s8 %v4459_v8  ;;  %v2723_v38 = vunpack.c.1.s8 %v4459_v8  ;;  %v2724_v40 = vunpack.c.0.s8 %v4472_v44  ;;  %v4508_v14 = vsel %vm4474_vm0, 16843009, %v3646_v58 }
 0x1ae   : > { %v2725_v63 = vunpack.c.1.s8 %v4472_v44  ;;  %v2727_v22 = vunpack.c.1.s8 %v4499_v47  ;;  %v2728_v19 = vunpack.c.0.s8 %v4508_v14  ;;  %v2729_v20 = vunpack.c.1.s8 %v4508_v14 }
 0x1af   : > { %vm4564_vm11 = vcmp.ne.s32.totalorder %v2722_v29, 0  ;;  %vm4576_vm12 = vcmp.ne.s32.totalorder %v2723_v38, 0  ;;  %v4610_v43 = vsel %vm4580_vm14, 16843009, %v3646_v58 }
 0x1f8   : > { %v2220_v61 = vpop.f32.mrb[0].mxu0 }
 0x1f9   : > { %v2222_v17 = vpop.f32.mrb[1].mxu0 }
 0x1fc   : > { %v1248_v41 = vpop.f32.mrb[0].mxu1  ;;  %v2227_v49 = vpop.f32.mrb[2].mxu0 }
 0x1fd   : > { %v4465_v23 = vadd.f32 %v2220_v61, %v1248_v41  ;;  %v1250_v0 = vpop.f32.mrb[1].mxu1  ;;  %v2229_v37 = vpop.f32.mrb[3].mxu0  ;;  %v2726_v61 = vunpack.c.0.s8 %v4499_v47  ;;  %v2731_v41 = vunpack.c.1.s8 %v4521_v57 }
 0x1fe   : > { %v4478_v7 = vadd.f32 %v2222_v17, %v1250_v0 }
 0x1ff   : > { %v2442_v36 = vmax.f32 %v4465_v23, 0.0  ;;  %v2607_v23 = vpack.c.b8 %v2606_v62, %v2606_v62  ;;  %vm4630_vm2 = vcmp.ne.s32.totalorder %v2726_v61, 0 }
 0x200   : > { %v1256_v1 = vpop.f32.mrb[2].mxu1  ;;  %v2234_v13 = vpop.f32.mrb[4].mxu0  ;;  %v2443_v56 = vmax.f32 %v4478_v7, 0.0  ;;  %v2609_v7 = vpack.c.b8 %v2608_v5, %v2608_v5 }
 0x201   : > { %v4515_v35 = vadd.f32 %v2227_v49, %v1256_v1  ;;  %v1258_v48 = vpop.f32.mrb[3].mxu1  ;;  %v2236_v54 = vpop.f32.mrb[5].mxu0  ;;  %v4572_v49 = vsel %vm318_vm9, 16843009, %v3646_v58  ;;  %v2842_v52 = vsel %vm4454_vm13, 1e+30, %v2442_v36  ;;  %vm4612_vm0 = vnez %v2607_v23 }
 0x202   : > { %v4528_v45 = vadd.f32 %v2229_v37, %v1258_v48  ;;  %v4586_v0 = vsel %vm4467_vm15, 1e+30, %v2443_v56  ;;  %v2547_v38 = vunpack.c.0.s8 %v4572_v49  ;;  %vm4598_vm13 = vcmp.ne.s32.totalorder %v2724_v40, 0 }
 0x203   : > { %v2444_v39 = vmax.f32 %v4515_v35, 0.0  ;;  %vm4603_vm15 = vcmp.ne.s32.totalorder %v2725_v63, 0  ;;  %v2549_v63 = vunpack.c.1.s8 %v4572_v49  ;;  %v4642_v28 = vsel %vm4612_vm0, 16843009, %v3646_v58 }
 0x204   : > { %v1264_v27 = vpop.f32.mrb[4].mxu1  ;;  %v2241_v55 = vpop.f32.mrb[6].mxu0  ;;  %v2445_v30 = vmax.f32 %v4528_v45, 0.0  ;;  %v2551_v23 = vunpack.c.2.s8 %v4572_v49 }
 0x205   : > { %v3188_v15 = vadd.f32 %v2234_v13, %v1264_v27  ;;  %v1266_v17 = vpop.f32.mrb[5].mxu1  ;;  %v2243_v18 = vpop.f32.mrb[7].mxu0  ;;  %v2844_v45 = vsel %vm4524_vm4, 1e+30, %v2444_v39  ;;  %v2610_v27 = vpack.c.b16 %v2547_v38, %v2546_v42  ;;  %vm4659_vm4 = vcmp.ne.s32.totalorder %v2728_v19, 0 }
 0x206   : > { %v3189_v25 = vadd.f32 %v2236_v54, %v1266_v17  ;;  %v2548_v54 = vunpack.c.1.s8 %v4562_v24  ;;  %v2734_v19 = vunpack.c.0.s8 %v4642_v28 }
 0x207   : > { %v2446_v59 = vmax.f32 %v3188_v15, 0.0 }
 0x208   : > { %v2447_v37 = vmax.f32 %v3189_v25, 0.0  ;;  %v1272_v51 = vpop.f32.mrb[6].mxu1  ;;  %v2248_v53 = vpop.f32.mrb[8].mxu0  ;;  %v2732_v25 = vunpack.c.0.s8 %v4610_v43  ;;  %v2612_v61 = vpack.c.b16 %v2549_v63, %v2548_v54  ;;  %vm4759_vm0 = vcmp.ne.s32.totalorder %v2734_v19, 0 }
 0x209   : > { %v2846_v46 = vsel %vm4480_vm1, 1e+30, %v2446_v59  ;;  %v3190_v2 = vadd.f32 %v2241_v55, %v1272_v51  ;;  %v1274_v32 = vpop.f32.mrb[7].mxu1  ;;  %v2250_v29 = vpop.f32.mrb[9].mxu0  ;;  %vm4616_vm1 = vnez %v2609_v7  ;;  %v2845_v55 = vsel %vm4537_vm7, 1e+30, %v2445_v30 }
 0x20a   : > { %v2906_v47 = vmin.f32 %v2842_v52, %v2846_v46  ;;  %v2847_v50 = vsel %vm4490_vm3, 1e+30, %v2447_v37  ;;  %v3191_v1 = vadd.f32 %v2243_v18, %v1274_v32  ;;  %vm4634_vm3 = vcmp.ne.s32.totalorder %v2727_v22, 0  ;;  %v303_v32 = vld [vmem:[%s5331_s2 + $0x40] sm:$0xff] }
 0x20b   : > { %v2943_v11 = vmin.f32 %v4586_v0, %v2847_v50  ;;  %v2448_v12 = vmax.f32 %v3190_v2, 0.0  ;;  %v2611_v7 = vpack.c.b8 %v2610_v27, %v2610_v27  ;;  %v2733_v2 = vunpack.c.1.s8 %v4610_v43 }
 0x20c   : > { %v2449_v44 = vmax.f32 %v3191_v1, 0.0  ;;  %v1280_v40 = vpop.f32.mrb[8].mxu1  ;;  %v2255_v35 = vpop.f32.mrb[10].mxu0  ;;  %v2735_v30 = vunpack.c.1.s8 %v4642_v28  ;;  %v2613_v3 = vpack.c.b8 %v2612_v61, %v2612_v61  ;;  %vm319_vm7 = vnez %v303_v32 }
 0x20d   : > { %v2848_v6 = vsel %vm4530_vm5, 1e+30, %v2448_v12  ;;  %v3192_v62 = vadd.f32 %v2248_v53, %v1280_v40  ;;  %v1282_v36 = vpop.f32.mrb[9].mxu1  ;;  %v2257_v56 = vpop.f32.mrb[11].mxu0  ;;  %v4651_v53 = vsel %vm4616_vm1, 16843009, %v3646_v58  ;;  %vm4683_vm6 = vnez %v2611_v7 }
 0x20e   : > { %v2907_v5 = vmin.f32 %v2844_v45, %v2848_v6  ;;  %v2849_v10 = vsel %vm4541_vm8, 1e+30, %v2449_v44  ;;  %v3193_v15 = vadd.f32 %v2250_v29, %v1282_v36  ;;  %vm4671_vm5 = vcmp.ne.s32.totalorder %v2729_v20, 0 }
 0x20f   : > { %v2944_v21 = vmin.f32 %v2845_v55, %v2849_v10  ;;  %v2450_v18 = vmax.f32 %v3192_v62, 0.0  ;;  %v2614_v44 = vpack.c.b16 %v2551_v23, %v2550_v9  ;;  %vm4693_vm8 = vcmp.ne.s32.totalorder %v2730_v34, 0 }
 0x210   : > { %v2451_v60 = vmax.f32 %v3193_v15, 0.0  ;;  %v1288_v52 = vpop.f32.mrb[10].mxu1  ;;  %v2262_v59 = vpop.f32.mrb[12].mxu0  ;;  %v4713_v15 = vsel %vm319_vm7, 16843009, %v3646_v58  ;;  %vm4727_vm14 = vcmp.ne.s32.totalorder %v2732_v25, 0 }
 0x211   : > { %v2850_v22 = vsel %vm4564_vm11, 1e+30, %v2450_v18  ;;  %v3194_v0 = vadd.f32 %v2255_v35, %v1288_v52  ;;  %v1290_v37 = vpop.f32.mrb[11].mxu1  ;;  %v2264_v51 = vpop.f32.mrb[13].mxu0  ;;  %vm4701_vm11 = vcmp.ne.s32.totalorder %v2731_v41, 0  ;;  %v2615_v10 = vpack.c.b8 %v2614_v44, %v2614_v44 }
 0x212   : > { %v4653_v42 = vmin.f32 %v2906_v47, %v2850_v22  ;;  %v2851_v39 = vsel %vm4576_vm12, 1e+30, %v2451_v60  ;;  %v3195_v46 = vadd.f32 %v2257_v56, %v1290_v37  ;;  %v304_v47 = vld [vmem:[%s5331_s2 + $0x48] sm:$0xff]  ;;  %v2553_v56 = vunpack.c.3.s8 %v4572_v49 }
 0x213   : > { %v4667_v29 = vmin.f32 %v2943_v11, %v2851_v39  ;;  %v2452_v38 = vmax.f32 %v3194_v0, 0.0  ;;  %v2736_v11 = vunpack.c.0.s8 %v4651_v53  ;;  %vm320_vm9 = vnez %v304_v47 }
 0x214   : > { %v2453_v50 = vmax.f32 %v3195_v46, 0.0  ;;  %v1296_v1 = vpop.f32.mrb[12].mxu1  ;;  %v2269_v12 = vpop.f32.mrb[14].mxu0  ;;  %vm4707_vm12 = vnez %v2613_v3  ;;  %v2737_v49 = vunpack.c.1.s8 %v4651_v53  ;;  %v4720_v18 = vsel %vm320_vm9, 16843009, %v3646_v58 }
 0x215   : > { %v2852_v14 = vsel %vm4598_vm13, 1e+30, %v2452_v38  ;;  %v3196_v20 = vadd.f32 %v2262_v59, %v1296_v1  ;;  %v1298_v40 = vpop.f32.mrb[13].mxu1  ;;  %v2271_v35 = vpop.f32.mrb[15].mxu0  ;;  %v4734_v61 = vsel %vm4683_vm6, 16843009, %v3646_v58  ;;  %v2616_v16 = vpack.c.b16 %v2553_v56, %v2552_v33 }
 0x216   : > { %v4687_v54 = vmin.f32 %v2907_v5, %v2852_v14  ;;  %v2853_v63 = vsel %vm4603_vm15, 1e+30, %v2453_v50  ;;  %v3197_v45 = vadd.f32 %v2264_v51, %v1298_v40  ;;  %vm4737_vm13 = vcmp.ne.s32.totalorder %v2733_v2, 0  ;;  %v305_v56 = vld [vmem:[%s5331_s2 + $0x50] sm:$0xff] }
 0x217   : > { %v4697_v13 = vmin.f32 %v2944_v21, %v2853_v63  ;;  %v2454_v62 = vmax.f32 %v3196_v20, 0.0  ;;  %v4744_v43 = vsel %vm4707_vm12, 16843009, %v3646_v58  ;;  %vm4746_vm15 = vnez %v2615_v10  ;;  %v306_v10 = vld [vmem:[%s5331_s2 + $0x58] sm:$0xff] }
 0x218   : > { %v2455_v27 = vmax.f32 %v3197_v45, 0.0  ;;  %v1304_v55 = vpop.f32.mrb[14].mxu1  ;;  %v2276_v34 = vpop.f32.mrb[16].mxu0  ;;  %v2554_v7 = vunpack.c.0.s8 %v4713_v15  ;;  %v2739_v38 = vunpack.c.1.s8 %v4734_v61  ;;  %v2740_v31 = vunpack.c.0.s8 %v4744_v43 }
 0x219   : > { %v2854_v57 = vsel %vm4630_vm2, 1e+30, %v2454_v62  ;;  %v3198_v41 = vadd.f32 %v2269_v12, %v1304_v55  ;;  %v1306_v21 = vpop.f32.mrb[15].mxu1  ;;  %v2278_v24 = vpop.f32.mrb[17].mxu0  ;;  %vm4767_vm1 = vcmp.ne.s32.totalorder %v2735_v30, 0  ;;  %v2617_v19 = vpack.c.b8 %v2616_v16, %v2616_v16 }
 0x21a   : > { %v2910_v60 = vmin.f32 %v4653_v42, %v2854_v57  ;;  %v2855_v52 = vsel %vm4634_vm3, 1e+30, %v2455_v27  ;;  %v3199_v59 = vadd.f32 %v2271_v35, %v1306_v21  ;;  %v2555_v42 = vunpack.c.0.s8 %v4720_v18 }
 0x21b   : > { %v2947_v9 = vmin.f32 %v4667_v29, %v2855_v52  ;;  %v2456_v23 = vmax.f32 %v3198_v41, 0.0  ;;  %v2738_v29 = vunpack.c.0.s8 %v4734_v61  ;;  %v4774_v8 = vsel %vm4746_vm15, 16843009, %v3646_v58 }
 0x21c   : > { %v2457_v25 = vmax.f32 %v3199_v59, 0.0  ;;  %v1312_v0 = vpop.f32.mrb[16].mxu1  ;;  %v2283_v37 = vpop.f32.mrb[18].mxu0  ;;  %v2618_v48 = vpack.c.b16 %v2555_v42, %v2554_v7  ;;  %v2557_v63 = vunpack.c.1.s8 %v4720_v18  ;;  %v2558_v62 = vunpack.c.2.s8 %v4713_v15 }
 0x21d   : > { %v2856_v39 = vsel %vm4659_vm4, 1e+30, %v2456_v23  ;;  %v3200_v46 = vadd.f32 %v2276_v34, %v1312_v0  ;;  %v1314_v2 = vpop.f32.mrb[17].mxu1  ;;  %v2285_v32 = vpop.f32.mrb[19].mxu0  ;;  %v2559_v33 = vunpack.c.2.s8 %v4720_v18  ;;  %vm4791_vm2 = vcmp.ne.s32.totalorder %v2736_v11, 0 }
 0x21e   : > { %v2911_v47 = vmin.f32 %v4687_v54, %v2856_v39  ;;  %v2857_v50 = vsel %vm4671_vm5, 1e+30, %v2457_v25  ;;  %v3201_v1 = vadd.f32 %v2278_v24, %v1314_v2  ;;  %v2556_v54 = vunpack.c.1.s8 %v4713_v15 }
 0x21f   : > { %v2948_v3 = vmin.f32 %v4697_v13, %v2857_v50  ;;  %v2458_v44 = vmax.f32 %v3200_v46, 0.0  ;;  %v2741_v5 = vunpack.c.1.s8 %v4744_v43  ;;  %vm4801_vm3 = vcmp.ne.s32.totalorder %v2737_v49, 0 }
 0x220   : > { %v2459_v20 = vmax.f32 %v3201_v1, 0.0  ;;  %v1320_v40 = vpop.f32.mrb[18].mxu1  ;;  %v2290_v35 = vpop.f32.mrb[20].mxu0  ;;  %v2742_v36 = vunpack.c.0.s8 %v4774_v8  ;;  %vm4806_vm4 = vnez %v2617_v19  ;;  %v2619_v52 = vpack.c.b8 %v2618_v48, %v2618_v48 }
 0x221   : > { %v2858_v28 = vsel %vm4693_vm8, 1e+30, %v2458_v44  ;;  %v3202_v30 = vadd.f32 %v2283_v37, %v1320_v40  ;;  %v1322_v45 = vpop.f32.mrb[19].mxu1  ;;  %v2292_v13 = vpop.f32.mrb[21].mxu0  ;;  %v2620_v59 = vpack.c.b16 %v2557_v63, %v2556_v54  ;;  %vm321_vm5 = vnez %v305_v56 }
 0x222   : > { %v4785_v27 = vmin.f32 %v2910_v60, %v2858_v28  ;;  %v2859_v55 = vsel %vm4701_vm11, 1e+30, %v2459_v20  ;;  %v3203_v34 = vadd.f32 %v2285_v32, %v1322_v45  ;;  %v2622_v16 = vpack.c.b16 %v2559_v33, %v2558_v62  ;;  %v307_v62 = vld [vmem:[%s5331_s2 + $0x60] sm:$0xff] }
 0x223   : > { %v4799_v57 = vmin.f32 %v2947_v9, %v2859_v55  ;;  %v2460_v41 = vmax.f32 %v3202_v30, 0.0  ;;  %vm322_vm6 = vnez %v306_v10  ;;  %vm4816_vm7 = vcmp.ne.s32.totalorder %v2738_v29, 0 }
 0x224   : > { %v2461_v11 = vmax.f32 %v3203_v34, 0.0  ;;  %v1328_v24 = vpop.f32.mrb[20].mxu1  ;;  %v2297_v60 = vpop.f32.mrb[22].mxu0  ;;  %v2743_v7 = vunpack.c.1.s8 %v4774_v8  ;;  %vm4823_vm8 = vcmp.ne.s32.totalorder %v2739_v38, 0  ;;  %v4830_v46 = vsel %vm4806_vm4, 16843009, %v3646_v58 }
 0x225   : > { %v2860_v61 = vsel %vm4727_vm14, 1e+30, %v2460_v41  ;;  %v3204_v9 = vadd.f32 %v2290_v35, %v1328_v24  ;;  %v1330_v49 = vpop.f32.mrb[21].mxu1  ;;  %v2299_v23 = vpop.f32.mrb[23].mxu0  ;;  %v4834_v22 = vsel %vm321_vm5, 16843009, %v3646_v58  ;;  %vm4836_vm9 = vnez %v2619_v52 }
 0x226   : > { %v4812_v25 = vmin.f32 %v2911_v47, %v2860_v61  ;;  %v2861_v0 = vsel %vm4737_vm13, 1e+30, %v2461_v11  ;;  %v3205_v37 = vadd.f32 %v2292_v13, %v1330_v49  ;;  %v2621_v38 = vpack.c.b8 %v2620_v59, %v2620_v59 }
 0x227   : > { %v4821_v42 = vmin.f32 %v2948_v3, %v2861_v0  ;;  %v2462_v17 = vmax.f32 %v3204_v9, 0.0  ;;  %v4842_v50 = vsel %vm322_vm6, 16843009, %v3646_v58  ;;  %v2623_v19 = vpack.c.b8 %v2622_v16, %v2622_v16 }
 0x228   : > { %v2463_v2 = vmax.f32 %v3205_v37, 0.0  ;;  %v1336_v32 = vpop.f32.mrb[22].mxu1  ;;  %v2304_v29 = vpop.f32.mrb[24].mxu0  ;;  %v2560_v20 = vunpack.c.3.s8 %v4713_v15  ;;  %vm4852_vm11 = vcmp.ne.s32.totalorder %v2740_v31, 0  ;;  %v2561_v12 = vunpack.c.3.s8 %v4720_v18 }
 0x229   : > { %v2862_v1 = vsel %vm4759_vm0, 1e+30, %v2462_v17  ;;  %v3206_v3 = vadd.f32 %v2297_v60, %v1336_v32  ;;  %v1338_v44 = vpop.f32.mrb[23].mxu1  ;;  %v2306_v8 = vpop.f32.mrb[25].mxu0  ;;  %v2562_v30 = vunpack.c.0.s8 %v4834_v22  ;;  %v2563_v15 = vunpack.c.0.s8 %v4842_v50 }
 0x22a   : > { %v2914_v40 = vmin.f32 %v4785_v27, %v2862_v1  ;;  %v2863_v35 = vsel %vm4767_vm1, 1e+30, %v2463_v2  ;;  %v3207_v48 = vadd.f32 %v2299_v23, %v1338_v44  ;;  %vm4860_vm12 = vcmp.ne.s32.totalorder %v2741_v5, 0 }
 0x22b   : > { %v2951_v63 = vmin.f32 %v4799_v57, %v2863_v35  ;;  %v2464_v28 = vmax.f32 %v3206_v3, 0.0  ;;  %v2744_v43 = vunpack.c.0.s8 %v4830_v46  ;;  %v2745_v31 = vunpack.c.1.s8 %v4830_v46 }
 0x22c   : > { %v2465_v45 = vmax.f32 %v3207_v48, 0.0  ;;  %v1344_v13 = vpop.f32.mrb[24].mxu1  ;;  %v2311_v14 = vpop.f32.mrb[26].mxu0  ;;  %v2698_v55 = vsel %vm4836_vm9, 16843009, %v3646_v58  ;;  %vm4871_vm14 = vnez %v2621_v38  ;;  %vm4878_vm13 = vcmp.ne.s32.totalorder %v2742_v36, 0 }
 0x22d   : > { %v2864_v18 = vsel %vm4791_vm2, 1e+30, %v2464_v28  ;;  %v3208_v33 = vadd.f32 %v2304_v29, %v1344_v13  ;;  %v1346_v56 = vpop.f32.mrb[25].mxu1  ;;  %v2313_v27 = vpop.f32.mrb[27].mxu0  ;;  %vm4882_vm15 = vnez %v2623_v19  ;;  %vm4887_vm0 = vcmp.ne.s32.totalorder %v2743_v7, 0 }
 0x22e   : > { %v2915_v5 = vmin.f32 %v4812_v25, %v2864_v18  ;;  %v2865_v10 = vsel %vm4801_vm3, 1e+30, %v2465_v45  ;;  %v3209_v57 = vadd.f32 %v2306_v8, %v1346_v56  ;;  %v2624_v60 = vpack.c.b16 %v2561_v12, %v2560_v20 }
 0x22f   : > { %v2952_v53 = vmin.f32 %v4821_v42, %v2865_v10  ;;  %v2466_v11 = vmax.f32 %v3208_v33, 0.0  ;;  %v2626_v52 = vpack.c.b16 %v2563_v15, %v2562_v30  ;;  %v2746_v36 = vunpack.c.0.s8 %v2698_v55 }
 0x230   : > { %v2467_v21 = vmax.f32 %v3209_v57, 0.0  ;;  %v1352_v59 = vpop.f32.mrb[26].mxu1  ;;  %v2318_v61 = vpop.f32.mrb[28].mxu0  ;;  %v2564_v9 = vunpack.c.1.s8 %v4834_v22  ;;  %v2565_v49 = vunpack.c.1.s8 %v4842_v50  ;;  %v2747_v37 = vunpack.c.1.s8 %v2698_v55  ;;  %v308_v57 = vld [vmem:[%s5331_s2 + $0x68] sm:$0xff] }
 0x231   : > { %v2866_v23 = vsel %vm4816_vm7, 1e+30, %v2466_v11  ;;  %v3210_v16 = vadd.f32 %v2311_v14, %v1352_v59  ;;  %v1354_v25 = vpop.f32.mrb[27].mxu1  ;;  %v2320_v0 = vpop.f32.mrb[29].mxu0  ;;  %v2699_v7 = vsel %vm4871_vm14, 16843009, %v3646_v58  ;;  %v2625_v38 = vpack.c.b8 %v2624_v60, %v2624_v60 }
 0x232   : > { %v4898_v42 = vmin.f32 %v2914_v40, %v2866_v23  ;;  %v2867_v17 = vsel %vm4823_vm8, 1e+30, %v2467_v21  ;;  %v3211_v46 = vadd.f32 %v2313_v27, %v1354_v25  ;;  %vm4902_vm1 = vcmp.ne.s32.totalorder %v2744_v43, 0 }
 0x233   : > { %v4909_v51 = vsel %vm4882_vm15, 16843009, %v3646_v58  ;;  %v4911_v32 = vmin.f32 %v2951_v63, %v2867_v17  ;;  %v2468_v29 = vmax.f32 %v3210_v16, 0.0  ;;  %vm4913_vm2 = vcmp.ne.s32.totalorder %v2745_v31, 0 }
 0x234   : > { %v2627_v39 = vpack.c.b8 %v2626_v52, %v2626_v52  ;;  %v2469_v1 = vmax.f32 %v3211_v46, 0.0  ;;  %v1360_v3 = vpop.f32.mrb[28].mxu1  ;;  %v2325_v44 = vpop.f32.mrb[30].mxu0  ;;  %v2628_v8 = vpack.c.b16 %v2565_v49, %v2564_v9  ;;  %v2566_v19 = vunpack.c.2.s8 %v4834_v22 }
 0x235   : > { %v2567_v20 = vunpack.c.2.s8 %v4842_v50  ;;  %v2868_v40 = vsel %vm4852_vm11, 1e+30, %v2468_v29  ;;  %v3212_v35 = vadd.f32 %v2318_v61, %v1360_v3  ;;  %v1362_v48 = vpop.f32.mrb[29].mxu1  ;;  %v2327_v12 = vpop.f32.mrb[31].mxu0  ;;  %v2748_v63 = vunpack.c.0.s8 %v2699_v7 }
 0x236   : > { %v2749_v28 = vunpack.c.1.s8 %v2699_v7  ;;  %v4921_v30 = vmin.f32 %v2915_v5, %v2868_v40  ;;  %v2869_v15 = vsel %vm4860_vm12, 1e+30, %v2469_v1  ;;  %v3213_v45 = vadd.f32 %v2320_v0, %v1362_v48 }
 0x237   : > { %vm4925_vm3 = vcmp.ne.s32.totalorder %v2746_v36, 0  ;;  %v2750_v14 = vunpack.c.0.s8 %v4909_v51  ;;  %v4930_v43 = vmin.f32 %v2952_v53, %v2869_v15  ;;  %v2470_v54 = vmax.f32 %v3212_v35, 0.0 }
 0x238   : > { %vm4932_vm4 = vcmp.ne.s32.totalorder %v2747_v37, 0  ;;  %v2751_v18 = vunpack.c.1.s8 %v4909_v51  ;;  %vm4937_vm5 = vnez %v2625_v38  ;;  %v2471_v56 = vmax.f32 %v3213_v45, 0.0  ;;  %v1368_v27 = vpop.f32.mrb[30].mxu1  ;;  %v2332_v55 = vpop.f32.mrb[32].mxu0 }
 0x239   : > { %vm4944_vm6 = vnez %v2627_v39  ;;  %v2629_v5 = vpack.c.b8 %v2628_v8, %v2628_v8  ;;  %v2630_v10 = vpack.c.b16 %v2567_v20, %v2566_v19  ;;  %v2870_v41 = vsel %vm4878_vm13, 1e+30, %v2470_v54  ;;  %v1370_v11 = vpop.f32.mrb[31].mxu1  ;;  %v2334_v60 = vpop.f32.mrb[33].mxu0 }
 0x23a   : > { %v3214_v53 = vadd.f32 %v2325_v44, %v1368_v27  ;;  %v2568_v52 = vunpack.c.3.s8 %v4834_v22  ;;  %v2569_v21 = vunpack.c.3.s8 %v4842_v50  ;;  %v2918_v59 = vmin.f32 %v4898_v42, %v2870_v41 }
 0x23b   : > { %v2871_v61 = vsel %vm4887_vm0, 1e+30, %v2471_v56  ;;  %v3215_v36 = vadd.f32 %v2327_v12, %v1370_v11  ;;  %vm4958_vm7 = vcmp.ne.s32.totalorder %v2748_v63, 0  ;;  %vm323_vm8 = vnez %v307_v62 }
 0x23c   : > { %v2955_v6 = vmin.f32 %v4911_v32, %v2871_v61  ;;  %v2472_v49 = vmax.f32 %v3214_v53, 0.0  ;;  %vm4963_vm9 = vcmp.ne.s32.totalorder %v2749_v28, 0  ;;  %v2701_v22 = vsel %vm4937_vm5, 16843009, %v3646_v58  ;;  %v1376_v24 = vpop.f32.mrb[32].mxu1  ;;  %v2339_v16 = vpop.f32.mrb[34].mxu0 }
 0x23d   : > { %vm324_vm11 = vnez %v308_v57  ;;  %v2473_v50 = vmax.f32 %v3215_v36, 0.0  ;;  %v2702_v25 = vsel %vm4944_vm6, 16843009, %v3646_v58  ;;  %vm4973_vm12 = vnez %v2629_v5  ;;  %v1378_v17 = vpop.f32.mrb[33].mxu1  ;;  %v2341_v46 = vpop.f32.mrb[35].mxu0 }
 0x23e   : > { %v2631_v37 = vpack.c.b8 %v2630_v10, %v2630_v10  ;;  %v2872_v7 = vsel %vm4902_vm1, 1e+30, %v2472_v49  ;;  %v3216_v42 = vadd.f32 %v2332_v55, %v1376_v24  ;;  %v2632_v32 = vpack.c.b16 %v2569_v21, %v2568_v52 }
 0x23f   : > { %v4981_v29 = vsel %vm323_vm8, 16843009, %v3646_v58  ;;  %v2919_v38 = vmin.f32 %v4921_v30, %v2872_v7  ;;  %v2873_v39 = vsel %vm4913_vm2, 1e+30, %v2473_v50  ;;  %v3217_v1 = vadd.f32 %v2334_v60, %v1378_v17 }
 0x240   : > { %vm4986_vm14 = vcmp.ne.s32.totalorder %v2750_v14, 0  ;;  %v4992_v2 = vsel %vm324_vm11, 16843009, %v3646_v58  ;;  %v2956_v44 = vmin.f32 %v4930_v43, %v2873_v39  ;;  %v2474_v8 = vmax.f32 %v3216_v42, 0.0  ;;  %v1384_v35 = vpop.f32.mrb[34].mxu1  ;;  %v2346_v48 = vpop.f32.mrb[36].mxu0 }
 0x241   : > { %v2752_v19 = vunpack.c.0.s8 %v2701_v22  ;;  %v2753_v20 = vunpack.c.1.s8 %v2701_v22  ;;  %v2475_v40 = vmax.f32 %v3217_v1, 0.0  ;;  %v2754_v12 = vunpack.c.0.s8 %v2702_v25  ;;  %v1386_v15 = vpop.f32.mrb[35].mxu1  ;;  %v2348_v45 = vpop.f32.mrb[37].mxu0 }
 0x242   : > { %v4998_v47 = vsel %vm4973_vm12, 16843009, %v3646_v58  ;;  %vm5000_vm13 = vnez %v2631_v37  ;;  %v2874_v28 = vsel %vm4925_vm3, 1e+30, %v2474_v8  ;;  %v3218_v30 = vadd.f32 %v2339_v16, %v1384_v35 }
 0x243   : > { %v2570_v14 = vunpack.c.0.s8 %v4981_v29  ;;  %v2571_v43 = vunpack.c.0.s8 %v4992_v2  ;;  %v5008_v54 = vmin.f32 %v2918_v59, %v2874_v28  ;;  %v2875_v33 = vsel %vm4932_vm4, 1e+30, %v2475_v40 }
 0x244   : > { %v3219_v62 = vadd.f32 %v2341_v46, %v1386_v15  ;;  %v2633_v56 = vpack.c.b8 %v2632_v32, %v2632_v32  ;;  %v5012_v27 = vmin.f32 %v2955_v6, %v2875_v33  ;;  %v2476_v55 = vmax.f32 %v3218_v30, 0.0  ;;  %v1392_v10 = vpop.f32.mrb[36].mxu1  ;;  %v2353_v57 = vpop.f32.mrb[38].mxu0 }
 0x245   : > { %vm5016_vm15 = vcmp.ne.s32.totalorder %v2751_v18, 0  ;;  %v2755_v34 = vunpack.c.1.s8 %v2702_v25  ;;  %vm5020_vm0 = vcmp.ne.s32.totalorder %v2752_v19, 0  ;;  %vm5024_vm1 = vcmp.ne.s32.totalorder %v2753_v20, 0  ;;  %v1394_v11 = vpop.f32.mrb[37].mxu1  ;;  %v2355_v60 = vpop.f32.mrb[39].mxu0 }
 0x246   : > { %v2477_v5 = vmax.f32 %v3219_v62, 0.0  ;;  %v2756_v53 = vunpack.c.0.s8 %v4998_v47  ;;  %v2876_v51 = vsel %vm4958_vm7, 1e+30, %v2476_v55  ;;  %v3220_v18 = vadd.f32 %v2346_v48, %v1392_v10 }
 0x247   : > { %v2704_v52 = vsel %vm5000_vm13, 16843009, %v3646_v58  ;;  %v2634_v21 = vpack.c.b16 %v2571_v43, %v2570_v14  ;;  %v5034_v59 = vmin.f32 %v2919_v38, %v2876_v51  ;;  %v3221_v36 = vadd.f32 %v2348_v45, %v1394_v11  ;;  %v310_v14 = vld [vmem:[%s5331_s2 + $0x78] sm:$0xff] }
 0x248   : > { %v2877_v61 = vsel %vm4963_vm9, 1e+30, %v2477_v5  ;;  %vm5038_vm2 = vcmp.ne.s32.totalorder %v2754_v12, 0  ;;  %vm5042_vm3 = vnez %v2633_v56  ;;  %v2478_v22 = vmax.f32 %v3220_v18, 0.0  ;;  %v1400_v25 = vpop.f32.mrb[38].mxu1  ;;  %v2360_v0 = vpop.f32.mrb[40].mxu0 }
 0x249   : > { %v5046_v49 = vmin.f32 %v2956_v44, %v2877_v61  ;;  %vm5048_vm4 = vcmp.ne.s32.totalorder %v2755_v34, 0  ;;  %v2572_v24 = vunpack.c.1.s8 %v4981_v29  ;;  %v2573_v23 = vunpack.c.1.s8 %v4992_v2  ;;  %v1402_v32 = vpop.f32.mrb[39].mxu1  ;;  %v2362_v38 = vpop.f32.mrb[41].mxu0  ;;  %v309_v12 = vld [vmem:[%s5331_s2 + $0x70] sm:$0xff] }
 0x24a   : > { %v2479_v16 = vmax.f32 %v3221_v36, 0.0  ;;  %v2757_v37 = vunpack.c.1.s8 %v4998_v47  ;;  %v2574_v7 = vunpack.c.2.s8 %v4981_v29  ;;  %v2575_v42 = vunpack.c.2.s8 %v4992_v2 }
 0x24b   : > { %v2878_v17 = vsel %vm4986_vm14, 1e+30, %v2478_v22  ;;  %v3222_v46 = vadd.f32 %v2353_v57, %v1400_v25  ;;  %v2758_v39 = vunpack.c.0.s8 %v2704_v52  ;;  %v2635_v1 = vpack.c.b8 %v2634_v21, %v2634_v21 }
 0x24c   : > { %v2922_v44 = vmin.f32 %v5008_v54, %v2878_v17  ;;  %v2879_v8 = vsel %vm5016_vm15, 1e+30, %v2479_v16  ;;  %v3223_v19 = vadd.f32 %v2355_v60, %v1402_v32  ;;  %v5065_v20 = vsel %vm5042_vm3, 16843009, %v3646_v58  ;;  %v1408_v63 = vpop.f32.mrb[40].mxu1  ;;  %v2367_v28 = vpop.f32.mrb[42].mxu0 }
 0x24d   : > { %v2959_v40 = vmin.f32 %v5012_v27, %v2879_v8  ;;  %v2480_v3 = vmax.f32 %v3222_v46, 0.0  ;;  %v2759_v35 = vunpack.c.1.s8 %v2704_v52  ;;  %v2636_v48 = vpack.c.b16 %v2573_v23, %v2572_v24  ;;  %v1410_v33 = vpop.f32.mrb[41].mxu1  ;;  %v2369_v62 = vpop.f32.mrb[43].mxu0 }
 0x24e   : > { %v2481_v47 = vmax.f32 %v3223_v19, 0.0  ;;  %vm5071_vm5 = vcmp.ne.s32.totalorder %v2756_v53, 0  ;;  %vm5075_vm6 = vcmp.ne.s32.totalorder %v2757_v37, 0  ;;  %v2638_v45 = vpack.c.b16 %v2575_v42, %v2574_v7 }
 0x24f   : > { %v2880_v43 = vsel %vm5020_vm0, 1e+30, %v2480_v3  ;;  %v3224_v54 = vadd.f32 %v2360_v0, %v1408_v63  ;;  %v2760_v56 = vunpack.c.0.s8 %v5065_v20  ;;  %vm5085_vm7 = vnez %v2635_v1 }
 0x250   : > { %v2923_v55 = vmin.f32 %v5034_v59, %v2880_v43  ;;  %v2881_v13 = vsel %vm5024_vm1, 1e+30, %v2481_v47  ;;  %v3225_v34 = vadd.f32 %v2362_v38, %v1410_v33  ;;  %vm5092_vm8 = vcmp.ne.s32.totalorder %v2758_v39, 0  ;;  %v1416_v18 = vpop.f32.mrb[42].mxu1  ;;  %v2374_v11 = vpop.f32.mrb[44].mxu0 }
 0x251   : > { %vm325_vm9 = vnez %v309_v12  ;;  %v2960_v10 = vmin.f32 %v5046_v49, %v2881_v13  ;;  %v2482_v57 = vmax.f32 %v3224_v54, 0.0  ;;  %vm5097_vm11 = vcmp.ne.s32.totalorder %v2759_v35, 0  ;;  %v1418_v61 = vpop.f32.mrb[43].mxu1  ;;  %v2376_v36 = vpop.f32.mrb[45].mxu0 }
 0x252   : > { %v2637_v53 = vpack.c.b8 %v2636_v48, %v2636_v48  ;;  %vm326_vm12 = vnez %v310_v14  ;;  %v2483_v51 = vmax.f32 %v3225_v34, 0.0  ;;  %v2639_v31 = vpack.c.b8 %v2638_v45, %v2638_v45 }
 0x253   : > { %v2576_v60 = vunpack.c.3.s8 %v4981_v29  ;;  %v2577_v52 = vunpack.c.3.s8 %v4992_v2  ;;  %v2882_v21 = vsel %vm5038_vm2, 1e+30, %v2482_v57  ;;  %v3226_v59 = vadd.f32 %v2367_v28, %v1416_v18 }
 0x254   : > { %v2761_v9 = vunpack.c.1.s8 %v5065_v20  ;;  %v5108_v49 = vsel %vm325_vm9, 16843009, %v3646_v58  ;;  %v5110_v22 = vmin.f32 %v2922_v44, %v2882_v21  ;;  %v2883_v24 = vsel %vm5048_vm4, 1e+30, %v2483_v51  ;;  %v1424_v37 = vpop.f32.mrb[44].mxu1  ;;  %v2381_v50 = vpop.f32.mrb[46].mxu0 }
 0x255   : > { %v3227_v29 = vadd.f32 %v2369_v62, %v1418_v61  ;;  %v5116_v2 = vsel %vm326_vm12, 16843009, %v3646_v58  ;;  %v5118_v6 = vmin.f32 %v2959_v40, %v2883_v24  ;;  %v2484_v23 = vmax.f32 %v3226_v59, 0.0  ;;  %v1426_v38 = vpop.f32.mrb[45].mxu1  ;;  %v2383_v39 = vpop.f32.mrb[47].mxu0 }
 0x256   : > { %vm5120_vm14 = vcmp.ne.s32.totalorder %v2760_v56, 0  ;;  %v2706_v25 = vsel %vm5085_vm7, 16843009, %v3646_v58  ;;  %vm5127_vm13 = vnez %v2637_v53  ;;  %vm5131_vm15 = vnez %v2639_v31 }
 0x257   : > { %v2485_v0 = vmax.f32 %v3227_v29, 0.0  ;;  %v2640_v17 = vpack.c.b16 %v2577_v52, %v2576_v60  ;;  %v2884_v46 = vsel %vm5071_vm5, 1e+30, %v2484_v23  ;;  %v3228_v32 = vadd.f32 %v2374_v11, %v1424_v37 }
 0x258   : > { %v2578_v1 = vunpack.c.0.s8 %v5108_v49  ;;  %v2579_v44 = vunpack.c.0.s8 %v5116_v2  ;;  %v5139_v8 = vmin.f32 %v2923_v55, %v2884_v46  ;;  %v3229_v20 = vadd.f32 %v2376_v36, %v1426_v38  ;;  %v1432_v63 = vpop.f32.mrb[46].mxu1  ;;  %v2388_v28 = vpop.f32.mrb[48].mxu0 }
 0x259   : > { %v2885_v19 = vsel %vm5075_vm6, 1e+30, %v2485_v0  ;;  %v2762_v40 = vunpack.c.0.s8 %v2706_v25  ;;  %v2486_v35 = vmax.f32 %v3228_v32, 0.0  ;;  %v2763_v48 = vunpack.c.1.s8 %v2706_v25  ;;  %v1434_v54 = vpop.f32.mrb[47].mxu1  ;;  %v2390_v33 = vpop.f32.mrb[49].mxu0 }
 0x25a   : > { %v5143_v3 = vmin.f32 %v2960_v10, %v2885_v19  ;;  %v2707_v12 = vsel %vm5127_vm13, 16843009, %v3646_v58  ;;  %v2487_v47 = vmax.f32 %v3229_v20, 0.0  ;;  %vm5148_vm0 = vcmp.ne.s32.totalorder %v2761_v9, 0 }
 0x25b   : > { %v5155_v15 = vsel %vm5131_vm15, 16843009, %v3646_v58  ;;  %v2641_v45 = vpack.c.b8 %v2640_v17, %v2640_v17  ;;  %v2886_v14 = vsel %vm5092_vm8, 1e+30, %v2486_v35  ;;  %v3230_v43 = vadd.f32 %v2381_v50, %v1432_v63 }
 0x25c   : > { %v2642_v62 = vpack.c.b16 %v2579_v44, %v2578_v1  ;;  %v2580_v56 = vunpack.c.1.s8 %v5108_v49  ;;  %v2926_v27 = vmin.f32 %v5110_v22, %v2886_v14  ;;  %v2887_v55 = vsel %vm5097_vm11, 1e+30, %v2487_v47  ;;  %v1440_v18 = vpop.f32.mrb[48].mxu1  ;;  %v2395_v11 = vpop.f32.mrb[50].mxu0 }
 0x25d   : > { %v3231_v13 = vadd.f32 %v2383_v39, %v1434_v54  ;;  %v2581_v34 = vunpack.c.1.s8 %v5116_v2  ;;  %v2963_v10 = vmin.f32 %v5118_v6, %v2887_v55  ;;  %v2488_v57 = vmax.f32 %v3230_v43, 0.0  ;;  %v1442_v59 = vpop.f32.mrb[49].mxu1  ;;  %v2397_v61 = vpop.f32.mrb[51].mxu0 }
 0x25e   : > { %vm5165_vm1 = vcmp.ne.s32.totalorder %v2762_v40, 0  ;;  %vm5169_vm2 = vcmp.ne.s32.totalorder %v2763_v48, 0  ;;  %v2764_v31 = vunpack.c.0.s8 %v2707_v12  ;;  %v2765_v41 = vunpack.c.1.s8 %v2707_v12 }
 0x25f   : > { %v2489_v51 = vmax.f32 %v3231_v13, 0.0  ;;  %v2766_v60 = vunpack.c.0.s8 %v5155_v15  ;;  %v2888_v52 = vsel %vm5120_vm14, 1e+30, %v2488_v57  ;;  %v3232_v21 = vadd.f32 %v2388_v28, %v1440_v18 }
 0x260   : > { %vm5176_vm3 = vnez %v2641_v45  ;;  %v2643_v9 = vpack.c.b8 %v2642_v62, %v2642_v62  ;;  %v2927_v22 = vmin.f32 %v5139_v8, %v2888_v52  ;;  %v3233_v29 = vadd.f32 %v2390_v33, %v1442_v59  ;;  %v1448_v50 = vpop.f32.mrb[50].mxu1  ;;  %v2402_v42 = vpop.f32.mrb[52].mxu0 }
 0x261   : > { %v2889_v24 = vsel %vm5148_vm0, 1e+30, %v2489_v51  ;;  %v2644_v6 = vpack.c.b16 %v2581_v34, %v2580_v56  ;;  %v2490_v25 = vmax.f32 %v3232_v21, 0.0  ;;  %v2582_v16 = vunpack.c.2.s8 %v5108_v49  ;;  %v1450_v39 = vpop.f32.mrb[51].mxu1  ;;  %v2404_v1 = vpop.f32.mrb[53].mxu0 }
 0x262   : > { %v2964_v23 = vmin.f32 %v5143_v3, %v2889_v24  ;;  %v2583_v0 = vunpack.c.2.s8 %v5116_v2  ;;  %v2491_v37 = vmax.f32 %v3233_v29, 0.0  ;;  %vm5186_vm4 = vcmp.ne.s32.totalorder %v2764_v31, 0 }
 0x263   : > { %vm5190_vm5 = vcmp.ne.s32.totalorder %v2765_v41, 0  ;;  %vm5194_vm6 = vcmp.ne.s32.totalorder %v2766_v60, 0  ;;  %v2890_v32 = vsel %vm5165_vm1, 1e+30, %v2490_v25  ;;  %v3234_v38 = vadd.f32 %v2395_v11, %v1448_v50 }
 0x264   : > { %v2767_v44 = vunpack.c.1.s8 %v5155_v15  ;;  %v2709_v8 = vsel %vm5176_vm3, 16843009, %v3646_v58  ;;  %v5204_v19 = vmin.f32 %v2926_v27, %v2890_v32  ;;  %v2891_v20 = vsel %vm5169_vm2, 1e+30, %v2491_v37  ;;  %v1456_v28 = vpop.f32.mrb[52].mxu1  ;;  %v2409_v30 = vpop.f32.mrb[54].mxu0 }
 0x265   : > { %v3235_v40 = vadd.f32 %v2397_v61, %v1450_v39  ;;  %vm5208_vm7 = vnez %v2643_v9  ;;  %v5212_v35 = vmin.f32 %v2963_v10, %v2891_v20  ;;  %v2492_v48 = vmax.f32 %v3234_v38, 0.0  ;;  %v1458_v33 = vpop.f32.mrb[53].mxu1  ;;  %v2411_v62 = vpop.f32.mrb[55].mxu0 }
 0x266   : > { %v2645_v12 = vpack.c.b8 %v2644_v6, %v2644_v6  ;;  %v2646_v47 = vpack.c.b16 %v2583_v0, %v2582_v16  ;;  %v2768_v15 = vunpack.c.0.s8 %v2709_v8  ;;  %v2584_v45 = vunpack.c.3.s8 %v5108_v49 }
 0x267   : > { %v2493_v63 = vmax.f32 %v3235_v40, 0.0  ;;  %v2585_v14 = vunpack.c.3.s8 %v5116_v2  ;;  %v2892_v43 = vsel %vm5186_vm4, 1e+30, %v2492_v48  ;;  %v3236_v54 = vadd.f32 %v2402_v42, %v1456_v28 }
 0x268   : > { %v2769_v56 = vunpack.c.1.s8 %v2709_v8  ;;  %v2710_v27 = vsel %vm5208_vm7, 16843009, %v3646_v58  ;;  %v5221_v55 = vmin.f32 %v2927_v22, %v2892_v43  ;;  %v3237_v34 = vadd.f32 %v2404_v1, %v1458_v33  ;;  %v1464_v51 = vpop.f32.mrb[54].mxu1  ;;  %v2416_v18 = vpop.f32.mrb[56].mxu0 }
 0x269   : > { %v2893_v13 = vsel %vm5190_vm5, 1e+30, %v2493_v63  ;;  %vm5225_vm8 = vcmp.ne.s32.totalorder %v2767_v44, 0  ;;  %v2494_v10 = vmax.f32 %v3236_v54, 0.0  ;;  %vm5231_vm9 = vnez %v2645_v12  ;;  %v1466_v21 = vpop.f32.mrb[55].mxu1  ;;  %v2418_v61 = vpop.f32.mrb[57].mxu0 }
 0x26a   : > { %v5229_v2 = vmin.f32 %v2964_v23, %v2893_v13  ;;  %v2647_v5 = vpack.c.b8 %v2646_v47, %v2646_v47  ;;  %v2495_v53 = vmax.f32 %v3237_v34, 0.0  ;;  %v2770_v11 = vunpack.c.0.s8 %v2710_v27 }
 0x26b   : > { %v2648_v31 = vpack.c.b16 %v2585_v14, %v2584_v45  ;;  %v2894_v41 = vsel %vm5194_vm6, 1e+30, %v2494_v10  ;;  %v3238_v60 = vadd.f32 %v2409_v30, %v1464_v51  ;;  %vm5237_vm11 = vcmp.ne.s32.totalorder %v2768_v15, 0 }
 0x26c   : > { %vm5241_vm12 = vcmp.ne.s32.totalorder %v2769_v56, 0  ;;  %v2930_v36 = vmin.f32 %v5204_v19, %v2894_v41  ;;  %v2895_v9 = vsel %vm5225_vm8, 1e+30, %v2495_v53  ;;  %v3239_v22 = vadd.f32 %v2411_v62, %v1466_v21  ;;  %v1472_v16 = vpop.f32.mrb[56].mxu1  ;;  %v2423_v37 = vpop.f32.mrb[58].mxu0 }
 0x26d   : > { %v2711_v24 = vsel %vm5231_vm9, 16843009, %v3646_v58  ;;  %v2967_v29 = vmin.f32 %v5212_v35, %v2895_v9  ;;  %v2496_v6 = vmax.f32 %v3238_v60, 0.0  ;;  %v2771_v23 = vunpack.c.1.s8 %v2710_v27  ;;  %v1474_v17 = vpop.f32.mrb[57].mxu1  ;;  %v2425_v46 = vpop.f32.mrb[59].mxu0 }
 0x26e   : > { %vm2680_vm14 = vnez %v2647_v5  ;;  %v2497_v25 = vmax.f32 %v3239_v22, 0.0  ;;  %vm5252_vm13 = vcmp.ne.s32.totalorder %v2770_v11, 0  ;;  %v2649_v50 = vpack.c.b8 %v2648_v31, %v2648_v31 }
 0x26f   : > { %v2896_v7 = vsel %vm5237_vm11, 1e+30, %v2496_v6  ;;  %v3240_v42 = vadd.f32 %v2416_v18, %v1472_v16  ;;  %v2772_v32 = vunpack.c.0.s8 %v2711_v24  ;;  %v2773_v38 = vunpack.c.1.s8 %v2711_v24 }
 0x270   : > { %v2931_v39 = vmin.f32 %v5221_v55, %v2896_v7  ;;  %v2897_v1 = vsel %vm5241_vm12, 1e+30, %v2497_v25  ;;  %v3241_v44 = vadd.f32 %v2418_v61, %v1474_v17  ;;  %v2712_v8 = vsel %vm2680_vm14, 16843009, %v3646_v58  ;;  %v1480_v3 = vpop.f32.mrb[58].mxu1  ;;  %v2430_v35 = vpop.f32.mrb[60].mxu0 }
 0x271   : > { %v2968_v19 = vmin.f32 %v5229_v2, %v2897_v1  ;;  %v2498_v20 = vmax.f32 %v3240_v42, 0.0  ;;  %vm2835_vm15 = vcmp.ne.s32.totalorder %v2771_v23, 0  ;;  %vm2681_vm0 = vnez %v2649_v50  ;;  %v1482_v47 = vpop.f32.mrb[59].mxu1  ;;  %v2432_v63 = vpop.f32.mrb[61].mxu0 }
 0x272   : > { %v2499_v40 = vmax.f32 %v3241_v44, 0.0  ;;  %v3242_v12 = vadd.f32 %v2423_v37, %v1480_v3  ;;  %vm2836_vm1 = vcmp.ne.s32.totalorder %v2772_v32, 0  ;;  %v2774_v28 = vunpack.c.0.s8 %v2712_v8  ;;  %v2980_v32 = vld [vmem:[%s4553_s9] sm:$0x3] }
 0x273   : > { %v2898_v48 = vsel %vm5252_vm13, 1e+30, %v2498_v20  ;;  %v3243_v45 = vadd.f32 %v2425_v46, %v1482_v47  ;;  %vm2837_vm2 = vcmp.ne.s32.totalorder %v2773_v38, 0  ;;  %v2775_v54 = vunpack.c.1.s8 %v2712_v8 }
 0x274   : > { %v2932_v30 = vmin.f32 %v2930_v36, %v2898_v48  ;;  %v2899_v15 = vsel %vm2835_vm15, 1e+30, %v2499_v40  ;;  %v2500_v43 = vmax.f32 %v3242_v12, 0.0  ;;  %v2713_v33 = vsel %vm2681_vm0, 16843009, %v3646_v58  ;;  %v1488_v56 = vpop.f32.mrb[60].mxu1 }
 0x275   : > { %v2969_v14 = vmin.f32 %v2967_v29, %v2899_v15  ;;  %v2501_v62 = vmax.f32 %v3243_v45, 0.0  ;;  %v2437_v27 = vpop.f32.mrb[62].mxu0  ;;  %v3244_v13 = vadd.f32 %v2430_v35, %v1488_v56  ;;  %vm2838_vm3 = vcmp.ne.s32.totalorder %v2774_v28, 0  ;;  %v1490_v34 = vpop.f32.mrb[61].mxu1 }
 0x276   : > { %v2900_v55 = vsel %vm2836_vm1, 1e+30, %v2500_v43  ;;  %v2439_v49 = vpop.f32.mrb[63].mxu0  ;;  %v3245_v57 = vadd.f32 %v2432_v63, %v1490_v34  ;;  %v2776_v5 = vunpack.c.0.s8 %v2713_v33  ;;  %vm2839_vm4 = vcmp.ne.s32.totalorder %v2775_v54, 0 }
 0x277   : > { %v2933_v2 = vmin.f32 %v2931_v39, %v2900_v55  ;;  %v2901_v10 = vsel %vm2837_vm2, 1e+30, %v2501_v62  ;;  %v2502_v51 = vmax.f32 %v3244_v13, 0.0  ;;  %v2777_v18 = vunpack.c.1.s8 %v2713_v33 }
 0x278   : > { %v2970_v53 = vmin.f32 %v2968_v19, %v2901_v10  ;;  %v2503_v11 = vmax.f32 %v3245_v57, 0.0  ;;  %v1496_v31 = vpop.f32.mrb[62].mxu1  ;;  %vm2840_vm5 = vcmp.ne.s32.totalorder %v2776_v5, 0  ;;  %v2983_v0 = vshrl.u32 %v290_v26, 7 }
 0x279   : > { %v2902_v41 = vsel %vm2838_vm3, 1e+30, %v2502_v51  ;;  %v3246_v58 = vadd.f32 %v2437_v27, %v1496_v31  ;;  %v1498_v60 = vpop.f32.mrb[63].mxu1  ;;  %vm2841_vm6 = vcmp.ne.s32.totalorder %v2777_v18, 0  ;;  %v3648_v39 = vmov 1966171168  }
 0x27a   : > { %v2934_v52 = vmin.f32 %v2932_v30, %v2902_v41  ;;  %v2903_v21 = vsel %vm2839_vm4, 1e+30, %v2503_v11  ;;  %v3247_v59 = vadd.f32 %v2439_v49, %v1498_v60  ;;  %v2984_v17 = vsub.s32 0, %v2983_v0 }
 0x27b   : > { %v2971_v61 = vmin.f32 %v2969_v14, %v2903_v21  ;;  %v2504_v36 = vmax.f32 %v3246_v58, 0.0  ;;  %v2988_v38 = vsub.s32 1, %v2983_v0  ;;  %v2998_v1 = vunpack.c.l.s4 %v3648_v39 }
 0x27c   : > { %v2505_v9 = vmax.f32 %v3247_v59, 0.0  ;;  %v2985_v20 = vrot.slane %v2980_v32, %v2984_v17 }
 0x27d   : > { %v2904_v22 = vsel %vm2840_vm5, 1e+30, %v2504_v36  ;;  %v2989_v3 = vrot.slane %v2980_v32, %v2988_v38  ;;  %v2999_v26 = vunpack.c.0.s8 %v2998_v1 }
 0x27e   : > { %v2935_v24 = vmin.f32 %v2933_v2, %v2904_v22  ;;  %v2905_v29 = vsel %vm2841_vm6, 1e+30, %v2505_v9 }
 0x27f   : > { %v2972_v6 = vmin.f32 %v2970_v53, %v2905_v29  ;;  %v3002_v63 = vsub.s32 %v2999_v26, %v2983_v0 }
 0x280   : > { %v2936_v23 = vmin.f32 %v2934_v52, %v2935_v24 }
 0x281   : > { %v2973_v25 = vmin.f32 %v2971_v61, %v2972_v6 }
 0x282   : > { %v2937_v16 = vrot.slane %v2936_v23, 4 }
 0x283   : > { %v2974_v37 = vrot.slane %v2973_v25, 4 }
 0x284   : > { %v2938_v50 = vmin.f32 %v2936_v23, %v2937_v16 }
 0x285   : > { %v2975_v7 = vmin.f32 %v2973_v25, %v2974_v37 }
 0x286   : > { %v2939_v42 = vrot.slane %v2938_v50, 2 }
 0x287   : > { %v2976_v46 = vrot.slane %v2975_v7, 2 }
 0x288   : > { %v2940_v44 = vmin.f32 %v2938_v50, %v2939_v42 }
 0x289   : > { %v2977_v8 = vmin.f32 %v2975_v7, %v2976_v46 }
 0x28a   : > { %v2941_v19 = vrot.slane %v2940_v44, 1 }
 0x28b   : > { %v2978_v40 = vrot.slane %v2977_v8, 1 }
 0x28c   : > { %v2942_v35 = vmin.f32 %v2940_v44, %v2941_v19 }
 0x28d   : > { %v2979_v48 = vmin.f32 %v2977_v8, %v2978_v40 }
 0x28e   : > { %v2992_v12 = vmin.f32 %v2942_v35, %v2985_v20 }
 0x28f   : > { %v2993_v47 = vmin.f32 %v2979_v48, %v2989_v3 }
 0x291   : > { %v2996_v28 = vcombine.low %v2992_v12, %v2993_v47 }
 0x293   : > { %v3003_v30 = vrot.slane %v2996_v28, %v3002_v63 }
 0x295   : > { %v3010_v15 = vrot.slane %v3003_v30, %v3002_v63 }
 0x297   : > { %3016 = vst.msk [vmem:[%s4553_s9] sm:$0x3] %vm4546_vm10, %v3010_v15 }
 0x29e   : > { %v3020_v45 = vld [vmem:[%s4553_s9] sm:$0x3] }
 0x29f   : > { %v3021_v14 = vmin.f32 %v3020_v45, 1e+12 }
 0x2a1   : > { %3563 = vrsqrt.f32 %v3021_v14  ;;  %vm3024_vm7 = vcmp.eq.f32.partialorder %v3021_v14, inf  ;;  %v3027_v33 = vand.u32 2147483648, %v3021_v14  ;;  %vm3026_vm8 = vcmp.eq.f32.partialorder %v3021_v14, 0.0 }
 0x2ab   : > { %v3564_v43 = vpop.eup %3563 }
 0x2ac   : > { %v3023_v54 = vmul.f32 %v3564_v43, %v3021_v14 }
 0x2ae   : > { %v3025_v62 = vsel %vm3024_vm7, %v3021_v14, %v3023_v54 }
 0x2af   : > { %v3028_v56 = vsel %vm3026_vm8, %v3027_v33, %v3025_v62 }
 0x2b0   : > { %3029 = vst.msk [vmem:[%s4553_s9] sm:$0x3] %vm4546_vm10, %v3028_v56 }
 0x2b1   : > { %3578 = shalt.err (!%p3575_p5)
}
 0x2b2   : > { %s3579_s7 = scalar_lea.hbm %s5277_s23, 32  ;;  %s3583_s4 = scalar_lea.hbm %s5332_s3, 96 }
 0x2b3   : > { %p3580_p6 = scmp.ne.s32.totalorder %s5277_s23, %s3579_s7  ;;  %p3584_p10 = scmp.lt.u32.totalorder %s5277_s23, %s5332_s3 }
 0x2b4   : > { %p3585_p11 = scmp.lt.u32.totalorder %s3583_s4, %s3579_s7  ;;  %p3587_p13 = scmp.lt.u32.totalorder %s3579_s7, %s5277_s23 }
 0x2b5   : > { %p3581_p7 = pnand %p3580_p6, %p3710_p4 }
 0x2b6   : > { %p3586_p12 = por %p3585_p11, %p3584_p10 }
 0x2b7   : > { %p3582_p9 = pneg %p3581_p7 }
 0x2b8   : > { %p3588_p0 = por %p3587_p13, %p3586_p12 }
 0x2ba   : > { %p3589_p1 = pnand %p3588_p0, %p3582_p9 }
 0x2bc   : > { %3592 = shalt.err (!%p3589_p1)
}
 0x2bd   : > { %3504 = dma.vmem_to_hbm [thread:$0]  (%p3710_p4), %s5279_s18, 32, %s5277_s23, %s3031_s15  }
 0x2be PF: > { %p3510_p2 = scmp.ge.s32.totalorder %s3643_s17, 2  ;;  %s3059_s8 = sand.u32 1, %s3623_s12  }
 0x2bf   : > { %s3060_s10 = scalar_lea.sflag [#allocation3], %s3059_s8 }
 0x2c0   : > { %p3507_p3 = pnand %p3510_p2, %p3717_p8 }
 0x2c2   : > { %3618 = dma.done.wait (!%p3507_p3), %s3060_s10, 32  }
 0x2c3   : > { %3620 = vsyncadd (!%p3507_p3), %s3060_s10, 4294967264  ;;  %s16_s17 = sadd.s32 1, %s3643_s17   ;;  %s5538_s12 = smov %s3627_s13 }
 0x2c4   : > { %p13_p5 = scmp.ge.s32.totalorder %s16_s17, 5   ;;  %s5539_s13 = smov %s3631_s14 }
 0x2c5   : > { %s5540_s14 = smov %s3723_s25  ;;  %s5541_s15 = smov %s3639_s16 }
 0x2c6   : > { %s5542_s16 = smov %s5544_s20  ;;  %15 = sbr.rel (!%p13_p5) target bundleno = 4 (0x4), region = 81 }
 0x2cd   :  { %3065 = vsyncpa [#allocation3], 1 }
 0x2ce   :  { %3067 = vsyncpa [#allocation3 + $0x1], 1 }

</bundles_post_ra>
